<compile_context>
chip_gen: v7x
topology: tpu7x:2x2x1
jax: 0.10.0
libtpu: 0.0.40
codegen_flags: <defaults>
</compile_context>

<pallas_src>
import functools
import math

import jax
import jax.numpy as jnp
from jax.experimental import pallas as pl
from jax.experimental.pallas import tpu as pltpu


def _resblock_kernel(mask_ref, x_ref,
                     wqkv_ref, bqkv_ref, wo_ref, bo_ref,
                     ln1g_ref, ln1b_ref, ln2g_ref, ln2b_ref,
                     w1_ref, b1_ref, w2_ref, b2_ref,
                     o_ref, ctx_ref, *, n_head, shared_mask):
    x = x_ref[0].astype(jnp.float32)                                    # (L, D)
    mask = (mask_ref[...] if shared_mask else mask_ref[0]).astype(jnp.float32)  # (L, L)
    L, D = x.shape
    hd = D // n_head
    eps = 1e-5

    def layernorm(v, g_ref, b_ref):
        mu = jnp.mean(v, axis=-1, keepdims=True)
        var = jnp.mean((v - mu) ** 2, axis=-1, keepdims=True)
        return (v - mu) * jax.lax.rsqrt(var + eps) * g_ref[...] + b_ref[...]

    # ---- attention branch: x + out_proj(softmax(q k^T / sqrt(hd) + mask) v) ----
    ln1 = layernorm(x, ln1g_ref, ln1b_ref)
    # fused QKV projection (1/sqrt(hd) already folded into W_q / b_q); bias add in
    # f32, then ONE cast of the whole (L, 3D) buffer to bf16.
    qkv = (jnp.dot(ln1.astype(jnp.bfloat16), wqkv_ref[...],
                   preferred_element_type=jnp.float32)
           + bqkv_ref[...]).astype(jnp.bfloat16)                        # (L, 3D) bf16

    for h in range(n_head):   # static unroll; every matmul stays a clean 2D MXU op
        lo, hi = h * hd, (h + 1) * hd
        qh = qkv[:, lo:hi]
        kh = qkv[:, D + lo:D + hi]
        vh = qkv[:, 2 * D + lo:2 * D + hi]
        # q @ k^T without materializing a transpose: contract dim 1 with dim 1.
        s = jax.lax.dot_general(qh, kh, (((1,), (1,)), ((), ())),
                                preferred_element_type=jnp.float32) + mask   # (L, L)
        s = s - jnp.max(s, axis=-1, keepdims=True)
        p = jnp.exp(s)
        p = p * pl.reciprocal(jnp.sum(p, axis=-1, keepdims=True), approx=True)
        ctx = jnp.dot(p.astype(jnp.bfloat16), vh,
                      preferred_element_type=jnp.float32)                    # (L, hd)
        ctx_ref[:, lo:hi] = ctx.astype(jnp.bfloat16)      # concat heads in VMEM scratch

    # single full-contraction-depth output projection (K = D) instead of n_head K=hd
    attn = jnp.dot(ctx_ref[...], wo_ref[...], preferred_element_type=jnp.float32)
    x = x + attn + bo_ref[...]

    # ---- MLP branch: x + c_proj(QuickGELU(c_fc(ln_2(x)))) ----
    ln2 = layernorm(x, ln2g_ref, ln2b_ref)
    h1 = (jnp.dot(ln2.astype(jnp.bfloat16), w1_ref[...],
                  preferred_element_type=jnp.float32)
          + b1_ref[...]).astype(jnp.bfloat16)                           # (L, 4D) bf16
    h1 = h1 * jax.nn.sigmoid(1.702 * h1)      # QuickGELU in bf16 (f32 accum below)
    h2 = jnp.dot(h1, w2_ref[...], preferred_element_type=jnp.float32) + b2_ref[...]

    o_ref[0] = (x + h2).astype(o_ref.dtype)


@functools.lru_cache(maxsize=None)
def _vmem_limit_bytes():
    """Raise the default 32 MiB scoped-VMEM limit, leaving headroom for the chip."""
    try:
        cap = int(getattr(pltpu.get_tpu_info(), "vmem_capacity_bytes", 128 << 20))
    except Exception:
        cap = 128 << 20
    return int(max(32 << 20, min(100 << 20, cap - (8 << 20))))


@functools.lru_cache(maxsize=None)
def _buffered_supported():
    """One eager probe for pipeline_mode=pl.Buffered(1) support (never hidden
    behind an outer jit, so the selection is robust and done exactly once)."""
    try:
        def _k(x_ref, o_ref):
            o_ref[...] = x_ref[...]
        probe = pl.pallas_call(
            _k,
            out_shape=jax.ShapeDtypeStruct((8, 128), jnp.float32),
            grid=(1,),
            in_specs=[pl.BlockSpec((8, 128), lambda i: (0, 0),
                                   pipeline_mode=pl.Buffered(1))],
            out_specs=pl.BlockSpec((8, 128), lambda i: (0, 0)),
        )(jnp.zeros((8, 128), jnp.float32))
        jax.block_until_ready(probe)
        return True
    except Exception:
        return False


def _run_block(x_nld, attn_mask, p, n_head):
    N, L, D = x_nld.shape
    shared_mask = attn_mask.ndim == 2
    single_buffer = _buffered_supported()

    def per_batch(shape):
        return pl.BlockSpec(shape, lambda b: (b,) + (0,) * (len(shape) - 1))

    def const_spec(shape):
        # Weights / biases / shared mask are identical for every grid step: a single
        # VMEM buffer is enough (default double-buffering would waste ~2x the bytes).
        if single_buffer:
            return pl.BlockSpec(shape, lambda b: (0,) * len(shape),
                                pipeline_mode=pl.Buffered(1))
        return pl.BlockSpec(shape, lambda b: (0,) * len(shape))

    mask_spec = const_spec((L, L)) if shared_mask else per_batch((1, L, L))

    in_specs = [
        mask_spec,                                         # additive attention mask
        per_batch((1, L, D)),                              # x
        const_spec((D, 3 * D)), const_spec((1, 3 * D)),    # fused W_qkv / b_qkv
        const_spec((D, D)), const_spec((1, D)),            # W_o / b_o
        const_spec((1, D)), const_spec((1, D)),            # ln_1 gamma / beta
        const_spec((1, D)), const_spec((1, D)),            # ln_2 gamma / beta
        const_spec((D, 4 * D)), const_spec((1, 4 * D)),    # c_fc
        const_spec((4 * D, D)), const_spec((1, D)),        # c_proj
    ]

    kernel = functools.partial(_resblock_kernel, n_head=n_head,
                               shared_mask=shared_mask)
    return pl.pallas_call(
        kernel,
        out_shape=jax.ShapeDtypeStruct((N, L, D), x_nld.dtype),
        grid=(N,),
        in_specs=in_specs,
        out_specs=per_batch((1, L, D)),
        scratch_shapes=[pltpu.VMEM((L, D), jnp.bfloat16)],   # per-head ctx concat
        compiler_params=pltpu.CompilerParams(
            dimension_semantics=("parallel",),
            vmem_limit_bytes=_vmem_limit_bytes(),
        ),
    )(attn_mask, x_nld,
      p["w_qkv"], p["b_qkv"], p["wo"], p["bo"],
      p["ln1_g"], p["ln1_b"], p["ln2_g"], p["ln2_b"],
      p["w_fc"], p["b_fc"], p["w_proj"], p["b_proj"])


def transformer_forward(x_lnd, attn_mask, layer_params, n_head):
    """x_lnd: (L, N, D).  attn_mask: additive float mask, either (L, L) shared
    across the batch or (N, L, L) per-batch (the PyTorch module's layout).
    Returns (L, N, D)."""
    x = jnp.transpose(x_lnd, (1, 0, 2))   # kernel layout (N, L, D)
    for p in layer_params:
        x = _run_block(x, attn_mask, p, n_head)
    return jnp.transpose(x, (1, 0, 2))


def init_params(key, width, layers):
    """Raw (PyTorch-equivalent) f32 parameters, weights stored in x @ W layout."""
    D = width
    params = []
    for l in range(layers):
        keys = jax.random.split(jax.random.fold_in(key, l), 6)
        sd = 1.0 / math.sqrt(D)
        params.append({
            "wq": jax.random.normal(keys[0], (D, D), jnp.float32) * sd,
            "wk": jax.random.normal(keys[1], (D, D), jnp.float32) * sd,
            "wv": jax.random.normal(keys[2], (D, D), jnp.float32) * sd,
            "bq": jnp.zeros((1, D), jnp.float32),
            "bk": jnp.zeros((1, D), jnp.float32),
            "bv": jnp.zeros((1, D), jnp.float32),
            "wo": jax.random.normal(keys[3], (D, D), jnp.float32) * sd,
            "bo": jnp.zeros((1, D), jnp.float32),
            "ln1_g": jnp.ones((1, D), jnp.float32),
            "ln1_b": jnp.zeros((1, D), jnp.float32),
            "ln2_g": jnp.ones((1, D), jnp.float32),
            "ln2_b": jnp.zeros((1, D), jnp.float32),
            "w_fc": jax.random.normal(keys[4], (D, 4 * D), jnp.float32) * sd,
            "b_fc": jnp.zeros((1, 4 * D), jnp.float32),
            "w_proj": jax.random.normal(keys[5], (4 * D, D), jnp.float32)
                      * (1.0 / math.sqrt(4 * D)),
            "b_proj": jnp.zeros((1, D), jnp.float32),
        })
    return params


def pack_params(raw, n_head):
    """Kernel-ready params: fold 1/sqrt(hd) into W_q/b_q (exactly once), fuse QKV,
    cast weights to bf16 (biases / LN params stay f32)."""
    D = raw["wq"].shape[0]
    assert D % n_head == 0
    scale = 1.0 / math.sqrt(D // n_head)
    w_qkv = jnp.concatenate([raw["wq"] * scale, raw["wk"], raw["wv"]], axis=1)
    b_qkv = jnp.concatenate([raw["bq"] * scale, raw["bk"], raw["bv"]], axis=1)
    bf16 = jnp.bfloat16
    return {
        "w_qkv": w_qkv.astype(bf16), "b_qkv": b_qkv.astype(jnp.float32),
        "wo": raw["wo"].astype(bf16), "bo": raw["bo"].astype(jnp.float32),
        "ln1_g": raw["ln1_g"], "ln1_b": raw["ln1_b"],
        "ln2_g": raw["ln2_g"], "ln2_b": raw["ln2_b"],
        "w_fc": raw["w_fc"].astype(bf16), "b_fc": raw["b_fc"].astype(jnp.float32),
        "w_proj": raw["w_proj"].astype(bf16), "b_proj": raw["b_proj"].astype(jnp.float32),
    }


def transformer_reference(x_lnd, attn_mask, raw_params, n_head):
    """Pure-JAX f32 reference replicating the PyTorch module."""
    x = jnp.transpose(x_lnd, (1, 0, 2))   # (N, L, D)
    N, L, D = x.shape
    hd = D // n_head
    scale = 1.0 / math.sqrt(hd)
    mask = attn_mask if attn_mask.ndim == 3 else jnp.broadcast_to(attn_mask, (N, L, L))

    def ln(v, g, b, eps=1e-5):
        mu = jnp.mean(v, -1, keepdims=True)
        var = jnp.mean((v - mu) ** 2, -1, keepdims=True)
        return (v - mu) / jnp.sqrt(var + eps) * g + b

    for p in raw_params:
        h = ln(x, p["ln1_g"], p["ln1_b"])
        q = (h @ p["wq"] + p["bq"]) * scale
        k = h @ p["wk"] + p["bk"]
        v = h @ p["wv"] + p["bv"]
        q = q.reshape(N, L, n_head, hd).transpose(0, 2, 1, 3)
        k = k.reshape(N, L, n_head, hd).transpose(0, 2, 1, 3)
        v = v.reshape(N, L, n_head, hd).transpose(0, 2, 1, 3)
        s = jnp.einsum("bhqd,bhkd->bhqk", q, k) + mask[:, None]
        w = jax.nn.softmax(s, axis=-1)
        ctx = jnp.einsum("bhqk,bhkd->bhqd", w, v)
        ctx = ctx.transpose(0, 2, 1, 3).reshape(N, L, D)
        x = x + ctx @ p["wo"] + p["bo"]
        h = ln(x, p["ln2_g"], p["ln2_b"])
        h1 = h @ p["w_fc"] + p["b_fc"]
        h1 = h1 * jax.nn.sigmoid(1.702 * h1)
        x = x + h1 @ p["w_proj"] + p["b_proj"]
    return jnp.transpose(x, (1, 0, 2))


if __name__ == "__main__":
    # Small but lane-aligned shapes: width=128 (multiple of 128), seq=16 (multiple
    # of 8), heads=4, layers=2, batch=2.
    width, layers, heads = 128, 2, 4
    L, N = 16, 2

    key = jax.random.PRNGKey(0)
    kx, kp = jax.random.split(key)
    x = jax.random.normal(kx, (L, N, width), jnp.float32)       # (L, N, D) like PyTorch
    causal = jnp.where(jnp.arange(L)[:, None] >= jnp.arange(L)[None, :],
                       0.0, -1e4).astype(jnp.float32)           # shared (L, L) mask

    raw_params = init_params(kp, width, layers)
    packed_params = [pack_params(p, heads) for p in raw_params]

    # Optimized path: shared (L, L) mask (single small DMA per layer).
    out_shared = jax.block_until_ready(
        transformer_forward(x, causal, packed_params, heads))
    # PyTorch-equivalent path: per-batch (N, L, L) additive mask.
    mask_batched = jnp.broadcast_to(causal, (N, L, L))
    out_batched = jax.block_until_ready(
        transformer_forward(x, mask_batched, packed_params, heads))

    assert out_shared.shape == (L, N, width)
    assert bool(jnp.all(jnp.isfinite(out_shared)))
    assert bool(jnp.all(jnp.isfinite(out_batched)))

    # Sanity check against the pure-f32 reference.  The kernel uses bf16 weights,
    # bf16 QuickGELU and an EUP approximate reciprocal in the softmax (deliberate
    # deviations), so use a loose, scale-aware tolerance.
    ref = transformer_reference(x, mask_batched, raw_params, heads)
    tol = 7.5e-2 * (1.0 + float(jnp.max(jnp.abs(ref))))
    for out in (out_shared, out_batched):
        max_err = float(jnp.max(jnp.abs(out - ref)))
        assert max_err < tol, f"max abs error {max_err} exceeds tolerance {tol}"
    print("KERNEL_OK")
</pallas_src>

<mosaic_0001>
module attributes {stable_mosaic.version = 11 : i64} {
  func.func @_k(%arg0: i32, %arg1: memref<8x128xf32, #tpu.memory_space<vmem>>, %arg2: memref<8x128xf32, #tpu.memory_space<vmem>>) attributes {dimension_semantics = [#tpu.dimension_semantics<arbitrary>], iteration_bounds = array<i64: 1>, scalar_prefetch = 0 : i64, scratch_operands = 0 : i64, tpu.core_type = #tpu.core_type<tc>, window_params = [{pipeline_mode = #tpu.pipeline_mode<synchronous>, transform_indices = @transform_0, window_bounds = array<i64: 8, 128>}, {pipeline_mode = #tpu.pipeline_mode<synchronous>, transform_indices = @transform_1, window_bounds = array<i64: 8, 128>}]} {
    %c0 = arith.constant 0 : index
    %c0_0 = arith.constant 0 : index
    %0 = vector.load %arg1[%c0, %c0_0] : memref<8x128xf32, #tpu.memory_space<vmem>>, vector<8x128xf32>
    %c0_1 = arith.constant 0 : index
    %c0_2 = arith.constant 0 : index
    %1 = vector.load %arg2[%c0_1, %c0_2] : memref<8x128xf32, #tpu.memory_space<vmem>>, vector<8x128xf32>
    tpu.vector_store %arg2[%c0_1, %c0_2], %0 {strides = array<i32>} : memref<8x128xf32, #tpu.memory_space<vmem>>, vector<8x128xf32>,
    return
  }
  func.func @transform_0(%arg0: i32) -> (i32, i32) {
    %c0_i32 = arith.constant 0 : i32
    %c0_i32_0 = arith.constant 0 : i32
    %c0_i32_1 = arith.constant 0 : i32
    return %c0_i32, %c0_i32_0 : i32, i32
  }
  func.func @transform_1(%arg0: i32) -> (i32, i32) {
    %c0_i32 = arith.constant 0 : i32
    %c0_i32_0 = arith.constant 0 : i32
    %c0_i32_1 = arith.constant 0 : i32
    return %c0_i32, %c0_i32_0 : i32, i32
  }
}

module attributes {stable_mosaic.version = 11 : i64} {
  func.func @_resblock_kernel(%arg0: i32, %arg1: memref<16x16xf32, #tpu.memory_space<vmem>>, %arg2: memref<1x16x128xf32, #tpu.memory_space<vmem>>, %arg3: memref<128x384xbf16, #tpu.memory_space<vmem>>, %arg4: memref<1x384xf32, #tpu.memory_space<vmem>>, %arg5: memref<128x128xbf16, #tpu.memory_space<vmem>>, %arg6: memref<1x128xf32, #tpu.memory_space<vmem>>, %arg7: memref<1x128xf32, #tpu.memory_space<vmem>>, %arg8: memref<1x128xf32, #tpu.memory_space<vmem>>, %arg9: memref<1x128xf32, #tpu.memory_space<vmem>>, %arg10: memref<1x128xf32, #tpu.memory_space<vmem>>, %arg11: memref<128x512xbf16, #tpu.memory_space<vmem>>, %arg12: memref<1x512xf32, #tpu.memory_space<vmem>>, %arg13: memref<512x128xbf16, #tpu.memory_space<vmem>>, %arg14: memref<1x128xf32, #tpu.memory_space<vmem>>, %arg15: memref<1x16x128xf32, #tpu.memory_space<vmem>>, %arg16: memref<16x128xbf16, #tpu.memory_space<vmem>>) attributes {dimension_semantics = [#tpu.dimension_semantics<parallel>], iteration_bounds = array<i64: 2>, scalar_prefetch = 0 : i64, scratch_operands = 1 : i64, tpu.core_type = #tpu.core_type<tc>, window_params = [{pipeline_mode = #tpu.pipeline_mode<synchronous>, transform_indices = @transform_0, window_bounds = array<i64: 16, 16>}, {transform_indices = @transform_1, window_bounds = array<i64: 1, 16, 128>}, {pipeline_mode = #tpu.pipeline_mode<synchronous>, transform_indices = @transform_2, window_bounds = array<i64: 128, 384>}, {pipeline_mode = #tpu.pipeline_mode<synchronous>, transform_indices = @transform_3, window_bounds = array<i64: 1, 384>}, {pipeline_mode = #tpu.pipeline_mode<synchronous>, transform_indices = @transform_4, window_bounds = array<i64: 128, 128>}, {pipeline_mode = #tpu.pipeline_mode<synchronous>, transform_indices = @transform_5, window_bounds = array<i64: 1, 128>}, {pipeline_mode = #tpu.pipeline_mode<synchronous>, transform_indices = @transform_6, window_bounds = array<i64: 1, 128>}, {pipeline_mode = #tpu.pipeline_mode<synchronous>, transform_indices = @transform_7, window_bounds = array<i64: 1, 128>}, {pipeline_mode = #tpu.pipeline_mode<synchronous>, transform_indices = @transform_8, window_bounds = array<i64: 1, 128>}, {pipeline_mode = #tpu.pipeline_mode<synchronous>, transform_indices = @transform_9, window_bounds = array<i64: 1, 128>}, {pipeline_mode = #tpu.pipeline_mode<synchronous>, transform_indices = @transform_10, window_bounds = array<i64: 128, 512>}, {pipeline_mode = #tpu.pipeline_mode<synchronous>, transform_indices = @transform_11, window_bounds = array<i64: 1, 512>}, {pipeline_mode = #tpu.pipeline_mode<synchronous>, transform_indices = @transform_12, window_bounds = array<i64: 512, 128>}, {pipeline_mode = #tpu.pipeline_mode<synchronous>, transform_indices = @transform_13, window_bounds = array<i64: 1, 128>}, {transform_indices = @transform_14, window_bounds = array<i64: 1, 16, 128>}]} {
    %c0 = arith.constant 0 : index
    %c0_0 = arith.constant 0 : index
    %c0_1 = arith.constant 0 : index
    %0 = vector.load %arg2[%c0, %c0_0, %c0_1] : memref<1x16x128xf32, #tpu.memory_space<vmem>>, vector<1x16x128xf32>
    %1 = vector.shape_cast %0 : vector<1x16x128xf32> to vector<16x128xf32>
    %c0_2 = arith.constant 0 : index
    %c0_3 = arith.constant 0 : index
    %2 = vector.load %arg1[%c0_2, %c0_3] : memref<16x16xf32, #tpu.memory_space<vmem>>, vector<16x16xf32>
    %cst = arith.constant dense<0.000000e+00> : vector<16xf32>
    %3 = vector.multi_reduction <add>, %1, %cst [1] : vector<16x128xf32> to vector<16xf32>
    %4 = vector.shape_cast %3 : vector<16xf32> to vector<16x1xf32>
    %cst_4 = arith.constant 1.280000e+02 : f32
    %5 = vector.broadcast %cst_4 : f32 to vector<16x1xf32>
    %6 = arith.divf %4, %5 : vector<16x1xf32>
    %7 = vector.broadcast %6 : vector<16x1xf32> to vector<16x128xf32>
    %8 = arith.subf %1, %7 : vector<16x128xf32>
    %9 = arith.mulf %8, %8 : vector<16x128xf32>
    %cst_5 = arith.constant dense<0.000000e+00> : vector<16xf32>
    %10 = vector.multi_reduction <add>, %9, %cst_5 [1] : vector<16x128xf32> to vector<16xf32>
    %11 = vector.shape_cast %10 : vector<16xf32> to vector<16x1xf32>
    %cst_6 = arith.constant 1.280000e+02 : f32
    %12 = vector.broadcast %cst_6 : f32 to vector<16x1xf32>
    %13 = arith.divf %11, %12 : vector<16x1xf32>
    %14 = vector.broadcast %6 : vector<16x1xf32> to vector<16x128xf32>
    %15 = arith.subf %1, %14 : vector<16x128xf32>
    %cst_7 = arith.constant 9.99999974E-6 : f32
    %16 = vector.broadcast %cst_7 : f32 to vector<16x1xf32>
    %17 = arith.addf %13, %16 : vector<16x1xf32>
    %18 = math.rsqrt %17 : vector<16x1xf32>
    %19 = vector.broadcast %18 : vector<16x1xf32> to vector<16x128xf32>
    %20 = arith.mulf %15, %19 : vector<16x128xf32>
    %c0_8 = arith.constant 0 : index
    %c0_9 = arith.constant 0 : index
    %21 = vector.load %arg7[%c0_8, %c0_9] : memref<1x128xf32, #tpu.memory_space<vmem>>, vector<1x128xf32>
    %22 = vector.broadcast %21 : vector<1x128xf32> to vector<16x128xf32>
    %23 = arith.mulf %20, %22 : vector<16x128xf32>
    %c0_10 = arith.constant 0 : index
    %c0_11 = arith.constant 0 : index
    %24 = vector.load %arg8[%c0_10, %c0_11] : memref<1x128xf32, #tpu.memory_space<vmem>>, vector<1x128xf32>
    %25 = vector.broadcast %24 : vector<1x128xf32> to vector<16x128xf32>
    %26 = arith.addf %23, %25 : vector<16x128xf32>
    %27 = arith.truncf %26 : vector<16x128xf32> to vector<16x128xbf16>
    %c0_12 = arith.constant 0 : index
    %c0_13 = arith.constant 0 : index
    %28 = vector.load %arg3[%c0_12, %c0_13] : memref<128x384xbf16, #tpu.memory_space<vmem>>, vector<128x384xbf16>
    %cst_14 = arith.constant dense<0.000000e+00> : vector<16x384xf32>
    %29 = tpu.matmul %27, %28, %cst_14 {dimension_numbers = #tpu.dot_dimension_numbers<[1], [0], [0], [1], [0, 0, 1, 1], [], []>} : vector<16x128xbf16>, vector<128x384xbf16>, vector<16x384xf32> -> vector<16x384xf32>
    %c0_15 = arith.constant 0 : index
    %c0_16 = arith.constant 0 : index
    %30 = vector.load %arg4[%c0_15, %c0_16] : memref<1x384xf32, #tpu.memory_space<vmem>>, vector<1x384xf32>
    %31 = vector.broadcast %30 : vector<1x384xf32> to vector<16x384xf32>
    %32 = arith.addf %29, %31 : vector<16x384xf32>
    %33 = arith.truncf %32 : vector<16x384xf32> to vector<16x384xbf16>
    %34 = vector.extract_strided_slice %33 {offsets = [0, 0], sizes = [16, 32], strides = [1, 1]} : vector<16x384xbf16> to vector<16x32xbf16>
    %35 = vector.extract_strided_slice %33 {offsets = [0, 128], sizes = [16, 32], strides = [1, 1]} : vector<16x384xbf16> to vector<16x32xbf16>
    %36 = vector.extract_strided_slice %33 {offsets = [0, 256], sizes = [16, 32], strides = [1, 1]} : vector<16x384xbf16> to vector<16x32xbf16>
    %cst_17 = arith.constant dense<0.000000e+00> : vector<16x16xf32>
    %37 = tpu.matmul %34, %35, %cst_17 {dimension_numbers = #tpu.dot_dimension_numbers<[1], [1], [0], [0], [0, 0, 1, 0], [], []>} : vector<16x32xbf16>, vector<16x32xbf16>, vector<16x16xf32> -> vector<16x16xf32>
    %38 = arith.addf %37, %2 : vector<16x16xf32>
    %cst_18 = arith.constant dense<0xFF800000> : vector<16xf32>
    %39 = vector.multi_reduction <maximumf>, %38, %cst_18 [1] : vector<16x16xf32> to vector<16xf32>
    %40 = vector.shape_cast %39 : vector<16xf32> to vector<16x1xf32>
    %41 = vector.broadcast %40 : vector<16x1xf32> to vector<16x16xf32>
    %42 = arith.subf %38, %41 : vector<16x16xf32>
    %43 = math.exp %42 : vector<16x16xf32>
    %cst_19 = arith.constant dense<0.000000e+00> : vector<16xf32>
    %44 = vector.multi_reduction <add>, %43, %cst_19 [1] : vector<16x16xf32> to vector<16xf32>
    %45 = vector.shape_cast %44 : vector<16xf32> to vector<16x1xf32>
    %46 = tpu.reciprocal %45 {approx = true} : vector<16x1xf32> -> vector<16x1xf32>
    %47 = vector.broadcast %46 : vector<16x1xf32> to vector<16x16xf32>
    %48 = arith.mulf %43, %47 : vector<16x16xf32>
    %49 = arith.truncf %48 : vector<16x16xf32> to vector<16x16xbf16>
    %cst_20 = arith.constant dense<0.000000e+00> : vector<16x32xf32>
    %50 = tpu.matmul %49, %36, %cst_20 {dimension_numbers = #tpu.dot_dimension_numbers<[1], [0], [0], [1], [0, 0, 1, 1], [], []>} : vector<16x16xbf16>, vector<16x32xbf16>, vector<16x32xf32> -> vector<16x32xf32>
    %51 = arith.truncf %50 : vector<16x32xf32> to vector<16x32xbf16>
    %c0_21 = arith.constant 0 : index
    %c0_22 = arith.constant 0 : index
    %52 = vector.load %arg16[%c0_21, %c0_22] : memref<16x128xbf16, #tpu.memory_space<vmem>>, vector<16x32xbf16>
    tpu.vector_store %arg16[%c0_21, %c0_22], %51 {strides = array<i32>} : memref<16x128xbf16, #tpu.memory_space<vmem>>, vector<16x32xbf16>,
    %53 = vector.extract_strided_slice %33 {offsets = [0, 32], sizes = [16, 32], strides = [1, 1]} : vector<16x384xbf16> to vector<16x32xbf16>
    %54 = vector.extract_strided_slice %33 {offsets = [0, 160], sizes = [16, 32], strides = [1, 1]} : vector<16x384xbf16> to vector<16x32xbf16>
    %55 = vector.extract_strided_slice %33 {offsets = [0, 288], sizes = [16, 32], strides = [1, 1]} : vector<16x384xbf16> to vector<16x32xbf16>
    %cst_23 = arith.constant dense<0.000000e+00> : vector<16x16xf32>
    %56 = tpu.matmul %53, %54, %cst_23 {dimension_numbers = #tpu.dot_dimension_numbers<[1], [1], [0], [0], [0, 0, 1, 0], [], []>} : vector<16x32xbf16>, vector<16x32xbf16>, vector<16x16xf32> -> vector<16x16xf32>
    %57 = arith.addf %56, %2 : vector<16x16xf32>
    %cst_24 = arith.constant dense<0xFF800000> : vector<16xf32>
    %58 = vector.multi_reduction <maximumf>, %57, %cst_24 [1] : vector<16x16xf32> to vector<16xf32>
    %59 = vector.shape_cast %58 : vector<16xf32> to vector<16x1xf32>
    %60 = vector.broadcast %59 : vector<16x1xf32> to vector<16x16xf32>
    %61 = arith.subf %57, %60 : vector<16x16xf32>
    %62 = math.exp %61 : vector<16x16xf32>
    %cst_25 = arith.constant dense<0.000000e+00> : vector<16xf32>
    %63 = vector.multi_reduction <add>, %62, %cst_25 [1] : vector<16x16xf32> to vector<16xf32>
    %64 = vector.shape_cast %63 : vector<16xf32> to vector<16x1xf32>
    %65 = tpu.reciprocal %64 {approx = true} : vector<16x1xf32> -> vector<16x1xf32>
    %66 = vector.broadcast %65 : vector<16x1xf32> to vector<16x16xf32>
    %67 = arith.mulf %62, %66 : vector<16x16xf32>
    %68 = arith.truncf %67 : vector<16x16xf32> to vector<16x16xbf16>
    %cst_26 = arith.constant dense<0.000000e+00> : vector<16x32xf32>
    %69 = tpu.matmul %68, %55, %cst_26 {dimension_numbers = #tpu.dot_dimension_numbers<[1], [0], [0], [1], [0, 0, 1, 1], [], []>} : vector<16x16xbf16>, vector<16x32xbf16>, vector<16x32xf32> -> vector<16x32xf32>
    %70 = arith.truncf %69 : vector<16x32xf32> to vector<16x32xbf16>
    %c0_27 = arith.constant 0 : index
    %c32 = arith.constant 32 : index
    %71 = vector.load %arg16[%c0_27, %c32] : memref<16x128xbf16, #tpu.memory_space<vmem>>, vector<16x32xbf16>
    tpu.vector_store %arg16[%c0_27, %c32], %70 {strides = array<i32>} : memref<16x128xbf16, #tpu.memory_space<vmem>>, vector<16x32xbf16>,
    %72 = vector.extract_strided_slice %33 {offsets = [0, 64], sizes = [16, 32], strides = [1, 1]} : vector<16x384xbf16> to vector<16x32xbf16>
    %73 = vector.extract_strided_slice %33 {offsets = [0, 192], sizes = [16, 32], strides = [1, 1]} : vector<16x384xbf16> to vector<16x32xbf16>
    %74 = vector.extract_strided_slice %33 {offsets = [0, 320], sizes = [16, 32], strides = [1, 1]} : vector<16x384xbf16> to vector<16x32xbf16>
    %cst_28 = arith.constant dense<0.000000e+00> : vector<16x16xf32>
    %75 = tpu.matmul %72, %73, %cst_28 {dimension_numbers = #tpu.dot_dimension_numbers<[1], [1], [0], [0], [0, 0, 1, 0], [], []>} : vector<16x32xbf16>, vector<16x32xbf16>, vector<16x16xf32> -> vector<16x16xf32>
    %76 = arith.addf %75, %2 : vector<16x16xf32>
    %cst_29 = arith.constant dense<0xFF800000> : vector<16xf32>
    %77 = vector.multi_reduction <maximumf>, %76, %cst_29 [1] : vector<16x16xf32> to vector<16xf32>
    %78 = vector.shape_cast %77 : vector<16xf32> to vector<16x1xf32>
    %79 = vector.broadcast %78 : vector<16x1xf32> to vector<16x16xf32>
    %80 = arith.subf %76, %79 : vector<16x16xf32>
    %81 = math.exp %80 : vector<16x16xf32>
    %cst_30 = arith.constant dense<0.000000e+00> : vector<16xf32>
    %82 = vector.multi_reduction <add>, %81, %cst_30 [1] : vector<16x16xf32> to vector<16xf32>
    %83 = vector.shape_cast %82 : vector<16xf32> to vector<16x1xf32>
    %84 = tpu.reciprocal %83 {approx = true} : vector<16x1xf32> -> vector<16x1xf32>
    %85 = vector.broadcast %84 : vector<16x1xf32> to vector<16x16xf32>
    %86 = arith.mulf %81, %85 : vector<16x16xf32>
    %87 = arith.truncf %86 : vector<16x16xf32> to vector<16x16xbf16>
    %cst_31 = arith.constant dense<0.000000e+00> : vector<16x32xf32>
    %88 = tpu.matmul %87, %74, %cst_31 {dimension_numbers = #tpu.dot_dimension_numbers<[1], [0], [0], [1], [0, 0, 1, 1], [], []>} : vector<16x16xbf16>, vector<16x32xbf16>, vector<16x32xf32> -> vector<16x32xf32>
    %89 = arith.truncf %88 : vector<16x32xf32> to vector<16x32xbf16>
    %c0_32 = arith.constant 0 : index
    %c64 = arith.constant 64 : index
    %90 = vector.load %arg16[%c0_32, %c64] : memref<16x128xbf16, #tpu.memory_space<vmem>>, vector<16x32xbf16>
    tpu.vector_store %arg16[%c0_32, %c64], %89 {strides = array<i32>} : memref<16x128xbf16, #tpu.memory_space<vmem>>, vector<16x32xbf16>,
    %91 = vector.extract_strided_slice %33 {offsets = [0, 96], sizes = [16, 32], strides = [1, 1]} : vector<16x384xbf16> to vector<16x32xbf16>
    %92 = vector.extract_strided_slice %33 {offsets = [0, 224], sizes = [16, 32], strides = [1, 1]} : vector<16x384xbf16> to vector<16x32xbf16>
    %93 = vector.extract_strided_slice %33 {offsets = [0, 352], sizes = [16, 32], strides = [1, 1]} : vector<16x384xbf16> to vector<16x32xbf16>
    %cst_33 = arith.constant dense<0.000000e+00> : vector<16x16xf32>
    %94 = tpu.matmul %91, %92, %cst_33 {dimension_numbers = #tpu.dot_dimension_numbers<[1], [1], [0], [0], [0, 0, 1, 0], [], []>} : vector<16x32xbf16>, vector<16x32xbf16>, vector<16x16xf32> -> vector<16x16xf32>
    %95 = arith.addf %94, %2 : vector<16x16xf32>
    %cst_34 = arith.constant dense<0xFF800000> : vector<16xf32>
    %96 = vector.multi_reduction <maximumf>, %95, %cst_34 [1] : vector<16x16xf32> to vector<16xf32>
    %97 = vector.shape_cast %96 : vector<16xf32> to vector<16x1xf32>
    %98 = vector.broadcast %97 : vector<16x1xf32> to vector<16x16xf32>
    %99 = arith.subf %95, %98 : vector<16x16xf32>
    %100 = math.exp %99 : vector<16x16xf32>
    %cst_35 = arith.constant dense<0.000000e+00> : vector<16xf32>
    %101 = vector.multi_reduction <add>, %100, %cst_35 [1] : vector<16x16xf32> to vector<16xf32>
    %102 = vector.shape_cast %101 : vector<16xf32> to vector<16x1xf32>
    %103 = tpu.reciprocal %102 {approx = true} : vector<16x1xf32> -> vector<16x1xf32>
    %104 = vector.broadcast %103 : vector<16x1xf32> to vector<16x16xf32>
    %105 = arith.mulf %100, %104 : vector<16x16xf32>
    %106 = arith.truncf %105 : vector<16x16xf32> to vector<16x16xbf16>
    %cst_36 = arith.constant dense<0.000000e+00> : vector<16x32xf32>
    %107 = tpu.matmul %106, %93, %cst_36 {dimension_numbers = #tpu.dot_dimension_numbers<[1], [0], [0], [1], [0, 0, 1, 1], [], []>} : vector<16x16xbf16>, vector<16x32xbf16>, vector<16x32xf32> -> vector<16x32xf32>
    %108 = arith.truncf %107 : vector<16x32xf32> to vector<16x32xbf16>
    %c0_37 = arith.constant 0 : index
    %c96 = arith.constant 96 : index
    %109 = vector.load %arg16[%c0_37, %c96] : memref<16x128xbf16, #tpu.memory_space<vmem>>, vector<16x32xbf16>
    tpu.vector_store %arg16[%c0_37, %c96], %108 {strides = array<i32>} : memref<16x128xbf16, #tpu.memory_space<vmem>>, vector<16x32xbf16>,
    %c0_38 = arith.constant 0 : index
    %c0_39 = arith.constant 0 : index
    %110 = vector.load %arg16[%c0_38, %c0_39] : memref<16x128xbf16, #tpu.memory_space<vmem>>, vector<16x128xbf16>
    %c0_40 = arith.constant 0 : index
    %c0_41 = arith.constant 0 : index
    %111 = vector.load %arg5[%c0_40, %c0_41] : memref<128x128xbf16, #tpu.memory_space<vmem>>, vector<128x128xbf16>
    %cst_42 = arith.constant dense<0.000000e+00> : vector<16x128xf32>
    %112 = tpu.matmul %110, %111, %cst_42 {dimension_numbers = #tpu.dot_dimension_numbers<[1], [0], [0], [1], [0, 0, 1, 1], [], []>} : vector<16x128xbf16>, vector<128x128xbf16>, vector<16x128xf32> -> vector<16x128xf32>
    %113 = arith.addf %1, %112 : vector<16x128xf32>
    %c0_43 = arith.constant 0 : index
    %c0_44 = arith.constant 0 : index
    %114 = vector.load %arg6[%c0_43, %c0_44] : memref<1x128xf32, #tpu.memory_space<vmem>>, vector<1x128xf32>
    %115 = vector.broadcast %114 : vector<1x128xf32> to vector<16x128xf32>
    %116 = arith.addf %113, %115 : vector<16x128xf32>
    %cst_45 = arith.constant dense<0.000000e+00> : vector<16xf32>
    %117 = vector.multi_reduction <add>, %116, %cst_45 [1] : vector<16x128xf32> to vector<16xf32>
    %118 = vector.shape_cast %117 : vector<16xf32> to vector<16x1xf32>
    %cst_46 = arith.constant 1.280000e+02 : f32
    %119 = vector.broadcast %cst_46 : f32 to vector<16x1xf32>
    %120 = arith.divf %118, %119 : vector<16x1xf32>
    %121 = vector.broadcast %120 : vector<16x1xf32> to vector<16x128xf32>
    %122 = arith.subf %116, %121 : vector<16x128xf32>
    %123 = arith.mulf %122, %122 : vector<16x128xf32>
    %cst_47 = arith.constant dense<0.000000e+00> : vector<16xf32>
    %124 = vector.multi_reduction <add>, %123, %cst_47 [1] : vector<16x128xf32> to vector<16xf32>
    %125 = vector.shape_cast %124 : vector<16xf32> to vector<16x1xf32>
    %cst_48 = arith.constant 1.280000e+02 : f32
    %126 = vector.broadcast %cst_48 : f32 to vector<16x1xf32>
    %127 = arith.divf %125, %126 : vector<16x1xf32>
    %128 = vector.broadcast %120 : vector<16x1xf32> to vector<16x128xf32>
    %129 = arith.subf %116, %128 : vector<16x128xf32>
    %cst_49 = arith.constant 9.99999974E-6 : f32
    %130 = vector.broadcast %cst_49 : f32 to vector<16x1xf32>
    %131 = arith.addf %127, %130 : vector<16x1xf32>
    %132 = math.rsqrt %131 : vector<16x1xf32>
    %133 = vector.broadcast %132 : vector<16x1xf32> to vector<16x128xf32>
    %134 = arith.mulf %129, %133 : vector<16x128xf32>
    %c0_50 = arith.constant 0 : index
    %c0_51 = arith.constant 0 : index
    %135 = vector.load %arg9[%c0_50, %c0_51] : memref<1x128xf32, #tpu.memory_space<vmem>>, vector<1x128xf32>
    %136 = vector.broadcast %135 : vector<1x128xf32> to vector<16x128xf32>
    %137 = arith.mulf %134, %136 : vector<16x128xf32>
    %c0_52 = arith.constant 0 : index
    %c0_53 = arith.constant 0 : index
    %138 = vector.load %arg10[%c0_52, %c0_53] : memref<1x128xf32, #tpu.memory_space<vmem>>, vector<1x128xf32>
    %139 = vector.broadcast %138 : vector<1x128xf32> to vector<16x128xf32>
    %140 = arith.addf %137, %139 : vector<16x128xf32>
    %141 = arith.truncf %140 : vector<16x128xf32> to vector<16x128xbf16>
    %c0_54 = arith.constant 0 : index
    %c0_55 = arith.constant 0 : index
    %142 = vector.load %arg11[%c0_54, %c0_55] : memref<128x512xbf16, #tpu.memory_space<vmem>>, vector<128x512xbf16>
    %cst_56 = arith.constant dense<0.000000e+00> : vector<16x512xf32>
    %143 = tpu.matmul %141, %142, %cst_56 {dimension_numbers = #tpu.dot_dimension_numbers<[1], [0], [0], [1], [0, 0, 1, 1], [], []>} : vector<16x128xbf16>, vector<128x512xbf16>, vector<16x512xf32> -> vector<16x512xf32>
    %c0_57 = arith.constant 0 : index
    %c0_58 = arith.constant 0 : index
    %144 = vector.load %arg12[%c0_57, %c0_58] : memref<1x512xf32, #tpu.memory_space<vmem>>, vector<1x512xf32>
    %145 = vector.broadcast %144 : vector<1x512xf32> to vector<16x512xf32>
    %146 = arith.addf %143, %145 : vector<16x512xf32>
    %147 = arith.truncf %146 : vector<16x512xf32> to vector<16x512xbf16>
    %cst_59 = arith.constant 1.703130e+00 : bf16
    %148 = vector.broadcast %cst_59 : bf16 to vector<16x512xbf16>
    %149 = arith.mulf %148, %147 : vector<16x512xbf16>
    %150 = arith.negf %149 : vector<16x512xbf16>
    %151 = math.exp %150 : vector<16x512xbf16>
    %cst_60 = arith.constant 1.000000e+00 : bf16
    %152 = vector.broadcast %cst_60 : bf16 to vector<16x512xbf16>
    %153 = arith.addf %152, %151 : vector<16x512xbf16>
    %154 = arith.divf %152, %153 : vector<16x512xbf16>
    %155 = arith.mulf %147, %154 : vector<16x512xbf16>
    %c0_61 = arith.constant 0 : index
    %c0_62 = arith.constant 0 : index
    %156 = vector.load %arg13[%c0_61, %c0_62] : memref<512x128xbf16, #tpu.memory_space<vmem>>, vector<512x128xbf16>
    %cst_63 = arith.constant dense<0.000000e+00> : vector<16x128xf32>
    %157 = tpu.matmul %155, %156, %cst_63 {dimension_numbers = #tpu.dot_dimension_numbers<[1], [0], [0], [1], [0, 0, 1, 1], [], []>} : vector<16x512xbf16>, vector<512x128xbf16>, vector<16x128xf32> -> vector<16x128xf32>
    %c0_64 = arith.constant 0 : index
    %c0_65 = arith.constant 0 : index
    %158 = vector.load %arg14[%c0_64, %c0_65] : memref<1x128xf32, #tpu.memory_space<vmem>>, vector<1x128xf32>
    %159 = vector.broadcast %158 : vector<1x128xf32> to vector<16x128xf32>
    %160 = arith.addf %157, %159 : vector<16x128xf32>
    %161 = arith.addf %116, %160 : vector<16x128xf32>
    %c0_66 = arith.constant 0 : index
    %c0_67 = arith.constant 0 : index
    %c0_68 = arith.constant 0 : index
    %162 = vector.load %arg15[%c0_66, %c0_67, %c0_68] : memref<1x16x128xf32, #tpu.memory_space<vmem>>, vector<1x16x128xf32>
    %163 = vector.shape_cast %162 : vector<1x16x128xf32> to vector<16x128xf32>
    %164 = vector.shape_cast %161 : vector<16x128xf32> to vector<1x16x128xf32>
    tpu.vector_store %arg15[%c0_66, %c0_67, %c0_68], %164 {strides = array<i32>} : memref<1x16x128xf32, #tpu.memory_space<vmem>>, vector<1x16x128xf32>,
    return
  }
  func.func @transform_0(%arg0: i32) -> (i32, i32) {
    %c0_i32 = arith.constant 0 : i32
    %c0_i32_0 = arith.constant 0 : i32
    %c0_i32_1 = arith.constant 0 : i32
    return %c0_i32, %c0_i32_0 : i32, i32
  }
  func.func @transform_1(%arg0: i32) -> (i32, i32, i32) {
    %c0_i32 = arith.constant 0 : i32
    %c0_i32_0 = arith.constant 0 : i32
    %c0_i32_1 = arith.constant 0 : i32
    return %arg0, %c0_i32, %c0_i32_0 : i32, i32, i32
  }
  func.func @transform_2(%arg0: i32) -> (i32, i32) {
    %c0_i32 = arith.constant 0 : i32
    %c0_i32_0 = arith.constant 0 : i32
    %c0_i32_1 = arith.constant 0 : i32
    return %c0_i32, %c0_i32_0 : i32, i32
  }
  func.func @transform_3(%arg0: i32) -> (i32, i32) {
    %c0_i32 = arith.constant 0 : i32
    %c0_i32_0 = arith.constant 0 : i32
    %c0_i32_1 = arith.constant 0 : i32
    return %c0_i32, %c0_i32_0 : i32, i32
  }
  func.func @transform_4(%arg0: i32) -> (i32, i32) {
    %c0_i32 = arith.constant 0 : i32
    %c0_i32_0 = arith.constant 0 : i32
    %c0_i32_1 = arith.constant 0 : i32
    return %c0_i32, %c0_i32_0 : i32, i32
  }
  func.func @transform_5(%arg0: i32) -> (i32, i32) {
    %c0_i32 = arith.constant 0 : i32
    %c0_i32_0 = arith.constant 0 : i32
    %c0_i32_1 = arith.constant 0 : i32
    return %c0_i32, %c0_i32_0 : i32, i32
  }
  func.func @transform_6(%arg0: i32) -> (i32, i32) {
    %c0_i32 = arith.constant 0 : i32
    %c0_i32_0 = arith.constant 0 : i32
    %c0_i32_1 = arith.constant 0 : i32
    return %c0_i32, %c0_i32_0 : i32, i32
  }
  func.func @transform_7(%arg0: i32) -> (i32, i32) {
    %c0_i32 = arith.constant 0 : i32
    %c0_i32_0 = arith.constant 0 : i32
    %c0_i32_1 = arith.constant 0 : i32
    return %c0_i32, %c0_i32_0 : i32, i32
  }
  func.func @transform_8(%arg0: i32) -> (i32, i32) {
    %c0_i32 = arith.constant 0 : i32
    %c0_i32_0 = arith.constant 0 : i32
    %c0_i32_1 = arith.constant 0 : i32
    return %c0_i32, %c0_i32_0 : i32, i32
  }
  func.func @transform_9(%arg0: i32) -> (i32, i32) {
    %c0_i32 = arith.constant 0 : i32
    %c0_i32_0 = arith.constant 0 : i32
    %c0_i32_1 = arith.constant 0 : i32
    return %c0_i32, %c0_i32_0 : i32, i32
  }
  func.func @transform_10(%arg0: i32) -> (i32, i32) {
    %c0_i32 = arith.constant 0 : i32
    %c0_i32_0 = arith.constant 0 : i32
    %c0_i32_1 = arith.constant 0 : i32
    return %c0_i32, %c0_i32_0 : i32, i32
  }
  func.func @transform_11(%arg0: i32) -> (i32, i32) {
    %c0_i32 = arith.constant 0 : i32
    %c0_i32_0 = arith.constant 0 : i32
    %c0_i32_1 = arith.constant 0 : i32
    return %c0_i32, %c0_i32_0 : i32, i32
  }
  func.func @transform_12(%arg0: i32) -> (i32, i32) {
    %c0_i32 = arith.constant 0 : i32
    %c0_i32_0 = arith.constant 0 : i32
    %c0_i32_1 = arith.constant 0 : i32
    return %c0_i32, %c0_i32_0 : i32, i32
  }
  func.func @transform_13(%arg0: i32) -> (i32, i32) {
    %c0_i32 = arith.constant 0 : i32
    %c0_i32_0 = arith.constant 0 : i32
    %c0_i32_1 = arith.constant 0 : i32
    return %c0_i32, %c0_i32_0 : i32, i32
  }
  func.func @transform_14(%arg0: i32) -> (i32, i32, i32) {
    %c0_i32 = arith.constant 0 : i32
    %c0_i32_0 = arith.constant 0 : i32
    %c0_i32_1 = arith.constant 0 : i32
    return %arg0, %c0_i32, %c0_i32_0 : i32, i32, i32
  }
}

</mosaic_0001>

<bundles_post_ra>
// kernel: tpu_custom_call.1
= control target key start
LH: loop header
LB: loop body
LE: loop exit
PB: predicated region body
PF: predicated region fallthrough
CT: control target
= control target key end

     0   :  { %6 = vsyncpa [#allocation3], 0  ;;  %s124_s0 = inlined_call_operand.hbm [shape: f32[8,128], index: 0, kind: input, shape index: {}]   ;;  %s125_s1 = inlined_call_operand.hbm [shape: f32[8,128], index: 1, kind: output, shape index: {}]  }
   0x1   :  { %7 = vsyncpa [#allocation4], 0  ;;  %s88_s6 = smov [#allocation2]   ;;  %s40_s10 = scalar_lea.hbm %s124_s0, 128 }
   0x2   :  { %s14_s7 = sshll.u32 %s88_s6, 4  ;;  %p41_p0 = scmp.ne.s32.totalorder %s124_s0, %s40_s10  ;;  %s15_s7 = int_to_ptr.vmem [resolvable:$true] %s14_s7 }
   0x3   :  { %p44_p1 = scmp.lt.u32.totalorder %s40_s10, %s124_s0 }
   0x5   :  { %p46_p2 = pnand %p44_p1, %p41_p0 }
   0x7   :  { %49 = shalt.err (!%p46_p2)
}
   0x8   :  { %s50_s15 = scalar_lea.vmem %s15_s7, 128  ;;  %p55_p4 = scmp.lt.s32.totalorder %s15_s7, %s15_s7 }
   0x9   :  { %p51_p3 = scmp.ne.s32.totalorder %s15_s7, %s50_s15  ;;  %p56_p5 = scmp.lt.s32.totalorder %s50_s15, %s50_s15 }
   0xb   :  { %p57_p6 = por %p56_p5, %p55_p4 }
   0xd   :  { %p58_p7 = pnand %p57_p6, %p51_p3 }
   0xf   :  { %61 = shalt.err (!%p58_p7)
}
  0x10   :  { %17 = dma.hbm_to_vmem [thread:$0]  %s124_s0, 128, %s15_s7, [#allocation3]  }
  0x11   :  { %84 = dma.done.wait [#allocation3], 128  }
  0x12   :  { %85 = vsyncadd [#allocation3], 4294967168  ;;  %s89_s18 = smov [#allocation5]   ;;  %v21_v0 = vld [vmem:[#allocation2] sm:$0xff] }
  0x13   :  { %s29_s19 = sshll.u32 %s89_s18, 4  ;;  %22 = vst [vmem:[#allocation5] sm:$0xff] %v21_v0  ;;  %s30_s19 = int_to_ptr.vmem [resolvable:$true] %s29_s19 }
  0x14   :  { %s62_s20 = scalar_lea.vmem %s30_s19, 128  ;;  %p67_p9 = scmp.lt.s32.totalorder %s30_s19, %s30_s19 }
  0x15   :  { %p63_p8 = scmp.ne.s32.totalorder %s30_s19, %s62_s20  ;;  %p68_p10 = scmp.lt.s32.totalorder %s62_s20, %s62_s20 }
  0x17   :  { %p69_p11 = por %p68_p10, %p67_p9 }
  0x19   :  { %p70_p12 = pnand %p69_p11, %p63_p8 }
  0x1b   :  { %73 = shalt.err (!%p70_p12)
}
  0x1c   :  { %s74_s23 = scalar_lea.hbm %s125_s1, 128 }
  0x1d   :  { %p75_p13 = scmp.ne.s32.totalorder %s125_s1, %s74_s23  ;;  %p78_p0 = scmp.lt.u32.totalorder %s74_s23, %s125_s1 }
  0x1f   :  { %p80_p1 = pnand %p78_p0, %p75_p13 }
  0x21   :  { %83 = shalt.err (!%p80_p1)
}
  0x22   :  { %32 = dma.vmem_to_hbm [thread:$0]  %s30_s19, 128, %s125_s1, [#allocation4]  }
  0x23   :  { %86 = dma.done.wait [#allocation4], 128  }
  0x24   :  { %87 = vsyncadd [#allocation4], 4294967168 }
  0x25   :  { %36 = vsyncpa [#allocation3], 1 }
  0x26   :  { %37 = vsyncpa [#allocation4], 1 }

// kernel: tpu_custom_call.1
= control target key start
LH: loop header
LB: loop body
LE: loop exit
PB: predicated region body
PF: predicated region fallthrough
CT: control target
= control target key end

     0   :  { %s4483_s0 = inlined_call_operand.hbm [shape: f32[16,16], index: 0, kind: input, shape index: {}]   ;;  %s4484_s1 = inlined_call_operand.hbm [shape: f32[2,16,128], index: 1, kind: input, shape index: {}]   ;;  %s4485_s2 = inlined_call_operand.hbm [shape: bf16[128,384], index: 2, kind: input, shape index: {}]   ;;  %s4486_s3 = inlined_call_operand.hbm [shape: f32[1,384], index: 3, kind: input, shape index: {}]   ;;  %s4487_s4 = inlined_call_operand.hbm [shape: bf16[128,128], index: 4, kind: input, shape index: {}]   ;;  %s4488_s5 = inlined_call_operand.hbm [shape: f32[1,128], index: 5, kind: input, shape index: {}]   ;;  %s4489_s6 = inlined_call_operand.hbm [shape: f32[1,128], index: 6, kind: input, shape index: {}]   ;;  %s4490_s7 = inlined_call_operand.hbm [shape: f32[1,128], index: 7, kind: input, shape index: {}]   ;;  %s4491_s8 = inlined_call_operand.hbm [shape: f32[1,128], index: 8, kind: input, shape index: {}]   ;;  %s4492_s9 = inlined_call_operand.hbm [shape: f32[1,128], index: 9, kind: input, shape index: {}]   ;;  %s4493_s10 = inlined_call_operand.hbm [shape: bf16[128,512], index: 10, kind: input, shape index: {}]   ;;  %s4494_s11 = inlined_call_operand.hbm [shape: f32[1,512], index: 11, kind: input, shape index: {}]   ;;  %s4495_s12 = inlined_call_operand.hbm [shape: bf16[512,128], index: 12, kind: input, shape index: {}]   ;;  %s4496_s13 = inlined_call_operand.hbm [shape: f32[1,128], index: 13, kind: input, shape index: {}]   ;;  %s4497_s14 = inlined_call_operand.hbm [shape: f32[2,16,128], index: 14, kind: output, shape index: {}]  }
   0x1   :  { %4513 = sst [smem:[#allocation41_spill]] %s4483_s0 }
   0x2   :  { %4514 = sst [smem:[#allocation42_spill]] %s4484_s1 }
   0x3   :  { %4515 = sst [smem:[#allocation43_spill]] %s4485_s2 }
   0x4   :  { %4516 = sst [smem:[#allocation44_spill]] %s4486_s3 }
   0x5   :  { %4517 = sst [smem:[#allocation45_spill]] %s4497_s14 }
   0x6   :  { %19 = vsyncpa [#allocation4], 0 }
   0x7   :  { %20 = vsyncpa [#allocation7], 0 }
   0x8   :  { %22 = vsyncpa [#allocation7 + $0x1], 0 }
   0x9   :  { %23 = vsyncpa [#allocation10], 0 }
   0xa   :  { %24 = vsyncpa [#allocation13], 0 }
   0xb   :  { %25 = vsyncpa [#allocation16], 0 }
   0xc   :  { %26 = vsyncpa [#allocation19], 0 }
   0xd   :  { %27 = vsyncpa [#allocation22], 0 }
   0xe   :  { %28 = vsyncpa [#allocation25], 0 }
   0xf   :  { %29 = vsyncpa [#allocation5], 0 }
  0x10   :  { %31 = vsyncpa [#allocation5 + $0x1], 0  ;;  %s3830_s29 = smov 0   ;;  %s3832_s30 = smov 0  }
  0x11   :  { %s3834_s15 = smov 0   ;;  %s3836_s16 = smov 0  }
  0x12 LB: > { %4518 = sst [smem:[#allocation37_spill]] %s3710_s29  ;;  %s3724_s17 = smov [#allocation8]   ;;  %s3722_s16 = sphi %s3836_s16, %s4569_s16   ;;  %s3718_s15 = sphi %s3834_s15, %s4568_s15   ;;  %s3714_s30 = sphi %s3832_s30, %s4567_s30   ;;  %s3710_s29 = sphi %s3830_s29, %s4565_s29  }
  0x13   : > { %4519 = sst [smem:[#allocation38_spill]] %s3714_s30  ;;  %s392_s18 = sshll.u32 %s3724_s17, 4  ;;  %s3856_s18 = int_to_ptr.vmem [resolvable:$true] %s392_s18 }
  0x14   : > { %s3851_s19 = sadd.s32 4294967295, %s3722_s16   ;;  %p2538_p0 = scmp.ge.s32.totalorder %s3722_s16, 1 }
  0x15   : > { %4520 = sst [smem:[#allocation39_spill]] %s3851_s19  ;;  %p4506_p1 = scmp.eq.s32.totalorder %s3851_s19, 0 }
  0x16   : > { %p367_p2 = scmp.lt.s32.totalorder %s3722_s16, 3  ;;  %s3725_s21 = smov [#allocation9]  }
  0x17   : > { %s406_s22 = sshll.u32 %s3725_s21, 4  ;;  %s3726_s24 = smov [#allocation12]   ;;  %s3871_s22 = int_to_ptr.vmem [resolvable:$true] %s406_s22 }
  0x18   : > { %p3858_p3 = pnand %p2538_p0, %p367_p2  ;;  %s430_s25 = sshll.u32 %s3726_s24, 4  ;;  %s3873_s25 = int_to_ptr.vmem [resolvable:$true] %s430_s25 }
  0x19   : > { %s4524_s2 = sld [smem:[#allocation43_spill]] }
  0x1a   : > { %s4521_s20 = scalar_select %p3858_p3, 1, 0 }
  0x1b   : > { %p2915_p5 = pneg %p3858_p3 }
  0x1c   : > { %4522 = sst [smem:[#allocation40_spill]] %s4521_s20 }
  0x1d   : > { %p3867_p6 = pnand %p2915_p5, %p4506_p1 }
  0x1f   : > { %s3230_s28 = scalar_lea.hbm %s4524_s2, 3072  ;;  %p3883_p8 = pneg %p3867_p6 }
  0x20   : > { %p3231_p7 = scmp.ne.s32.totalorder %s4524_s2, %s3230_s28  ;;  %p3237_p11 = scmp.lt.u32.totalorder %s3230_s28, %s4524_s2 }
  0x22   : > { %p3233_p9 = pnand %p3883_p8, %p3231_p7 }
  0x24   : > { %p3234_p10 = pneg %p3233_p9 }
  0x26   : > { %p3239_p12 = pnand %p3237_p11, %p3234_p10 }
  0x28   : > { %3242 = shalt.err (!%p3239_p12)
}
  0x29   : > { %s3243_s14 = scalar_lea.vmem %s3856_s18, 3072  ;;  %p3251_p5 = scmp.lt.s32.totalorder %s3856_s18, %s3856_s18 }
  0x2a   : > { %p3244_p13 = scmp.ne.s32.totalorder %s3856_s18, %s3243_s14  ;;  %p3252_p4 = scmp.lt.s32.totalorder %s3243_s14, %s3243_s14 }
  0x2c   : > { %p3246_p0 = pnand %p3244_p13, %p3883_p8  ;;  %p3253_p7 = por %p3252_p4, %p3251_p5 }
  0x2e   : > { %p3247_p2 = pneg %p3246_p0 }
  0x30   : > { %p3254_p9 = pnand %p3253_p7, %p3247_p2 }
  0x32   : > { %3257 = shalt.err (!%p3254_p9)
}
  0x33   : > { %s3727_s26 = smov 192   ;;  %s3728_s20 = smov 12  }
  0x34   : > { %2921 = dma.hbm_to_vmem [thread:$0]  (!%p3867_p6), %s4524_s2, 3072, %s3856_s18, [#allocation7], %s3727_s26, %s3727_s26, %s3728_s20  }
  0x35   : > { %s4526_s3 = sld [smem:[#allocation44_spill]] }
  0x3b   : > { %s3258_s1 = scalar_lea.hbm %s4526_s3, 48 }
  0x3c   : > { %p3259_p4 = scmp.ne.s32.totalorder %s4526_s3, %s3258_s1  ;;  %p3265_p12 = scmp.lt.u32.totalorder %s3258_s1, %s4526_s3 }
  0x3e   : > { %p3261_p10 = pnand %p3259_p4, %p3883_p8 }
  0x40   : > { %p3262_p11 = pneg %p3261_p10 }
  0x42   : > { %p3267_p13 = pnand %p3265_p12, %p3262_p11 }
  0x44   : > { %3270 = shalt.err (!%p3267_p13)
}
  0x45   : > { %s3271_s18 = scalar_lea.vmem %s3871_s22, 48  ;;  %s3278_s29 = scalar_lea.vmem %s3871_s22, 64 }
  0x46   : > { %p3272_p0 = scmp.ne.s32.totalorder %s3871_s22, %s3271_s18  ;;  %p3279_p7 = scmp.lt.s32.totalorder %s3871_s22, %s3871_s22 }
  0x47   : > { %p3280_p9 = scmp.lt.s32.totalorder %s3278_s29, %s3271_s18 }
  0x48   : > { %p3274_p2 = pnand %p3272_p0, %p3883_p8 }
  0x49   : > { %p3281_p4 = por %p3280_p9, %p3279_p7 }
  0x4a   : > { %p3275_p5 = pneg %p3274_p2 }
  0x4c   : > { %p3282_p10 = pnand %p3281_p4, %p3275_p5 }
  0x4e   : > { %3285 = shalt.err (!%p3282_p10)
}
  0x4f   : > { %2924 = dma.hbm_to_vmem [thread:$0]  (!%p3867_p6), %s4526_s3, 48, %s3871_s22, [#allocation10]  }
  0x50   : > { %s3286_s20 = scalar_lea.hbm %s4488_s5, 16 }
  0x51   : > { %p3287_p11 = scmp.ne.s32.totalorder %s4488_s5, %s3286_s20  ;;  %p3293_p0 = scmp.lt.u32.totalorder %s3286_s20, %s4488_s5 }
  0x53   : > { %p3289_p12 = pnand %p3287_p11, %p3883_p8 }
  0x55   : > { %p3290_p13 = pneg %p3289_p12 }
  0x57   : > { %p3295_p2 = pnand %p3293_p0, %p3290_p13 }
  0x59   : > { %3298 = shalt.err (!%p3295_p2)
}
  0x5a   : > { %s3299_s22 = scalar_lea.vmem %s3873_s25, 16  ;;  %s3306_s14 = scalar_lea.vmem %s3873_s25, 32 }
  0x5b   : > { %p3300_p5 = scmp.ne.s32.totalorder %s3873_s25, %s3299_s22  ;;  %p3307_p4 = scmp.lt.s32.totalorder %s3873_s25, %s3873_s25 }
  0x5c   : > { %p3308_p10 = scmp.lt.s32.totalorder %s3306_s14, %s3299_s22 }
  0x5d   : > { %p3302_p7 = pnand %p3300_p5, %p3883_p8 }
  0x5e   : > { %p3309_p11 = por %p3308_p10, %p3307_p4 }
  0x5f   : > { %p3303_p9 = pneg %p3302_p7 }
  0x61   : > { %p3310_p12 = pnand %p3309_p11, %p3303_p9 }
  0x63   : > { %3313 = shalt.err (!%p3310_p12)
}
  0x64   : > { %2930 = dma.hbm_to_vmem [thread:$0]  (!%p3867_p6), %s4488_s5, 16, %s3873_s25, [#allocation13]  }
  0x65   : > { %s3729_s1 = smov [#allocation15]   ;;  %s3730_s19 = smov [#allocation18]  }
  0x66   : > { %s452_s30 = sshll.u32 %s3729_s1, 4  ;;  %s474_s26 = sshll.u32 %s3730_s19, 4  ;;  %s453_s30 = int_to_ptr.vmem [resolvable:$true] %s452_s30  ;;  %s475_s26 = int_to_ptr.vmem [resolvable:$true] %s474_s26 }
  0x67   : > { %s3314_s28 = scalar_lea.hbm %s4490_s7, 16 }
  0x68   : > { %p3315_p13 = scmp.ne.s32.totalorder %s4490_s7, %s3314_s28  ;;  %p3321_p5 = scmp.lt.u32.totalorder %s3314_s28, %s4490_s7 }
  0x6a   : > { %p3317_p0 = pnand %p3315_p13, %p3883_p8 }
  0x6c   : > { %p3318_p2 = pneg %p3317_p0 }
  0x6e   : > { %p3323_p7 = pnand %p3321_p5, %p3318_p2 }
  0x70   : > { %3326 = shalt.err (!%p3323_p7)
}
  0x71   : > { %s3327_s25 = scalar_lea.vmem %s453_s30, 16  ;;  %s3334_s18 = scalar_lea.vmem %s453_s30, 32 }
  0x72   : > { %p3328_p9 = scmp.ne.s32.totalorder %s453_s30, %s3327_s25  ;;  %p3335_p11 = scmp.lt.s32.totalorder %s453_s30, %s453_s30 }
  0x73   : > { %p3336_p12 = scmp.lt.s32.totalorder %s3334_s18, %s3327_s25 }
  0x74   : > { %p3330_p4 = pnand %p3328_p9, %p3883_p8 }
  0x75   : > { %p3337_p1 = por %p3336_p12, %p3335_p11 }
  0x76   : > { %p3331_p10 = pneg %p3330_p4 }
  0x78   : > { %p3338_p3 = pnand %p3337_p1, %p3331_p10 }
  0x7a   : > { %3341 = shalt.err (!%p3338_p3)
}
  0x7b   : > { %2936 = dma.hbm_to_vmem [thread:$0]  (!%p3867_p6), %s4490_s7, 16, %s453_s30, [#allocation16]  }
  0x7c   : > { %s3342_s27 = scalar_lea.hbm %s4492_s9, 16 }
  0x7d   : > { %p3343_p13 = scmp.ne.s32.totalorder %s4492_s9, %s3342_s27  ;;  %p3349_p3 = scmp.lt.u32.totalorder %s3342_s27, %s4492_s9 }
  0x7f   : > { %p3345_p0 = pnand %p3343_p13, %p3883_p8 }
  0x81   : > { %p3346_p1 = pneg %p3345_p0 }
  0x83   : > { %p3351_p2 = pnand %p3349_p3, %p3346_p1 }
  0x85   : > { %3354 = shalt.err (!%p3351_p2)
}
  0x86   : > { %s3355_s14 = scalar_lea.vmem %s475_s26, 16  ;;  %s3362_s30 = scalar_lea.vmem %s475_s26, 32 }
  0x87   : > { %p3356_p5 = scmp.ne.s32.totalorder %s475_s26, %s3355_s14  ;;  %p3363_p4 = scmp.lt.s32.totalorder %s475_s26, %s475_s26 }
  0x88   : > { %p3364_p10 = scmp.lt.s32.totalorder %s3362_s30, %s3355_s14 }
  0x89   : > { %p3358_p7 = pnand %p3356_p5, %p3883_p8 }
  0x8a   : > { %p3365_p11 = por %p3364_p10, %p3363_p4 }
  0x8b   : > { %p3359_p9 = pneg %p3358_p7 }
  0x8d   : > { %p3366_p12 = pnand %p3365_p11, %p3359_p9 }
  0x8f   : > { %3369 = shalt.err (!%p3366_p12)
}
  0x90   : > { %2942 = dma.hbm_to_vmem [thread:$0]  (!%p3867_p6), %s4492_s9, 16, %s475_s26, [#allocation19]  }
  0x91   : > { %s3731_s29 = smov [#allocation21]   ;;  %s3732_s19 = smov [#allocation3]  }
  0x92   : > { %s498_s1 = sshll.u32 %s3731_s29, 4  ;;  %s379_s20 = sshll.u32 %s3732_s19, 4  ;;  %s499_s1 = int_to_ptr.vmem [resolvable:$true] %s498_s1  ;;  %s380_s20 = int_to_ptr.vmem [resolvable:$true] %s379_s20 }
  0x93   : > { %s3370_s17 = scalar_lea.hbm %s4494_s11, 64 }
  0x94   : > { %p3371_p13 = scmp.ne.s32.totalorder %s4494_s11, %s3370_s17  ;;  %p3377_p3 = scmp.lt.u32.totalorder %s3370_s17, %s4494_s11 }
  0x96   : > { %p3373_p0 = pnand %p3371_p13, %p3883_p8 }
  0x98   : > { %p3374_p1 = pneg %p3373_p0 }
  0x9a   : > { %p3379_p2 = pnand %p3377_p3, %p3374_p1 }
  0x9c   : > { %3382 = shalt.err (!%p3379_p2)
}
  0x9d   : > { %s3383_s26 = scalar_lea.vmem %s499_s1, 64  ;;  %p3391_p4 = scmp.lt.s32.totalorder %s499_s1, %s499_s1 }
  0x9e   : > { %p3384_p5 = scmp.ne.s32.totalorder %s499_s1, %s3383_s26  ;;  %p3392_p10 = scmp.lt.s32.totalorder %s3383_s26, %s3383_s26 }
  0xa0   : > { %p3386_p7 = pnand %p3384_p5, %p3883_p8  ;;  %p3393_p11 = por %p3392_p10, %p3391_p4 }
  0xa2   : > { %p3387_p9 = pneg %p3386_p7 }
  0xa4   : > { %p3394_p12 = pnand %p3393_p11, %p3387_p9 }
  0xa6   : > { %3397 = shalt.err (!%p3394_p12)
}
  0xa7   : > { %2948 = dma.hbm_to_vmem [thread:$0]  (!%p3867_p6), %s4494_s11, 64, %s499_s1, [#allocation22]  }
  0xa8   : > { %s4527_s0 = sld [smem:[#allocation41_spill]] }
  0xae   : > { %s3398_s27 = scalar_lea.hbm %s4527_s0, 256 }
  0xaf   : > { %p3399_p13 = scmp.ne.s32.totalorder %s4527_s0, %s3398_s27  ;;  %p3405_p3 = scmp.lt.u32.totalorder %s3398_s27, %s4527_s0 }
  0xb1   : > { %p3401_p0 = pnand %p3399_p13, %p3883_p8 }
  0xb3   : > { %p3402_p1 = pneg %p3401_p0 }
  0xb5   : > { %p3407_p2 = pnand %p3405_p3, %p3402_p1 }
  0xb7   : > { %3410 = shalt.err (!%p3407_p2)
}
  0xb8   : > { %s3411_s14 = scalar_lea.vmem %s380_s20, 256  ;;  %p3419_p4 = scmp.lt.s32.totalorder %s380_s20, %s380_s20 }
  0xb9   : > { %p3412_p5 = scmp.ne.s32.totalorder %s380_s20, %s3411_s14  ;;  %p3420_p10 = scmp.lt.s32.totalorder %s3411_s14, %s3411_s14 }
  0xbb   : > { %p3414_p7 = pnand %p3412_p5, %p3883_p8  ;;  %p3421_p11 = por %p3420_p10, %p3419_p4 }
  0xbd   : > { %p3415_p9 = pneg %p3414_p7 }
  0xbf   : > { %p3422_p12 = pnand %p3421_p11, %p3415_p9 }
  0xc1   : > { %3425 = shalt.err (!%p3422_p12)
}
  0xc2   : > { %s4508_s1 = smov 128   ;;  %s4509_s30 = smov 8  }
  0xc3   : > { %2918 = dma.hbm_to_vmem [thread:$0]  (!%p3867_p6), %s4527_s0, 256, %s380_s20, [#allocation4], %s4508_s1, %s4508_s1, %s4509_s30  }
  0xc4   : > { %s3735_s18 = smov [#allocation11]   ;;  %s3426_s28 = scalar_lea.hbm %s4487_s4, 1024 }
  0xc5   : > { %s416_s29 = sshll.u32 %s3735_s18, 4  ;;  %p3427_p13 = scmp.ne.s32.totalorder %s4487_s4, %s3426_s28  ;;  %s417_s29 = int_to_ptr.vmem [resolvable:$true] %s416_s29 }
  0xc6   : > { %p3433_p3 = scmp.lt.u32.totalorder %s3426_s28, %s4487_s4 }
  0xc7   : > { %p3429_p0 = pnand %p3427_p13, %p3883_p8 }
  0xc9   : > { %p3430_p1 = pneg %p3429_p0 }
  0xcb   : > { %p3435_p2 = pnand %p3433_p3, %p3430_p1 }
  0xcd   : > { %3438 = shalt.err (!%p3435_p2)
}
  0xce   : > { %s3439_s20 = scalar_lea.vmem %s417_s29, 1024  ;;  %p3447_p4 = scmp.lt.s32.totalorder %s417_s29, %s417_s29 }
  0xcf   : > { %p3440_p5 = scmp.ne.s32.totalorder %s417_s29, %s3439_s20  ;;  %p3448_p10 = scmp.lt.s32.totalorder %s3439_s20, %s3439_s20 }
  0xd1   : > { %p3442_p7 = pnand %p3440_p5, %p3883_p8  ;;  %p3449_p11 = por %p3448_p10, %p3447_p4 }
  0xd3   : > { %p3443_p9 = pneg %p3442_p7 }
  0xd5   : > { %p3450_p12 = pnand %p3449_p11, %p3443_p9 }
  0xd7   : > { %3453 = shalt.err (!%p3450_p12)
}
  0xd8   : > { %s4510_s26 = smov 64   ;;  %s4511_s25 = smov 4  }
  0xd9   : > { %2927 = dma.hbm_to_vmem [thread:$0]  (!%p3867_p6), %s4487_s4, 1024, %s417_s29, [#allocation10], %s4510_s26, %s4510_s26, %s4511_s25  }
  0xda   : > { %s3738_s27 = smov [#allocation14]   ;;  %s3739_s17 = smov [#allocation17]  }
  0xdb   : > { %s441_s28 = sshll.u32 %s3738_s27, 4  ;;  %s463_s24 = sshll.u32 %s3739_s17, 4  ;;  %s442_s28 = int_to_ptr.vmem [resolvable:$true] %s441_s28  ;;  %s4048_s24 = int_to_ptr.vmem [resolvable:$true] %s463_s24 }
  0xdc   : > { %s3454_s20 = scalar_lea.hbm %s4489_s6, 16 }
  0xdd   : > { %p3455_p13 = scmp.ne.s32.totalorder %s4489_s6, %s3454_s20  ;;  %p3461_p3 = scmp.lt.u32.totalorder %s3454_s20, %s4489_s6 }
  0xdf   : > { %p3457_p0 = pnand %p3455_p13, %p3883_p8 }
  0xe1   : > { %p3458_p1 = pneg %p3457_p0 }
  0xe3   : > { %p3463_p2 = pnand %p3461_p3, %p3458_p1 }
  0xe5   : > { %3466 = shalt.err (!%p3463_p2)
}
  0xe6   : > { %s3467_s19 = scalar_lea.vmem %s442_s28, 16  ;;  %s3474_s27 = scalar_lea.vmem %s442_s28, 32 }
  0xe7   : > { %p3468_p5 = scmp.ne.s32.totalorder %s442_s28, %s3467_s19  ;;  %p3475_p4 = scmp.lt.s32.totalorder %s442_s28, %s442_s28 }
  0xe8   : > { %p3476_p10 = scmp.lt.s32.totalorder %s3474_s27, %s3467_s19 }
  0xe9   : > { %p3470_p7 = pnand %p3468_p5, %p3883_p8 }
  0xea   : > { %p3477_p11 = por %p3476_p10, %p3475_p4 }
  0xeb   : > { %p3471_p9 = pneg %p3470_p7 }
  0xed   : > { %p3478_p12 = pnand %p3477_p11, %p3471_p9 }
  0xef   : > { %3481 = shalt.err (!%p3478_p12)
}
  0xf0   : > { %2933 = dma.hbm_to_vmem [thread:$0]  (!%p3867_p6), %s4489_s6, 16, %s442_s28, [#allocation13]  }
  0xf1   : > { %s3482_s14 = scalar_lea.hbm %s4491_s8, 16 }
  0xf2   : > { %p3483_p13 = scmp.ne.s32.totalorder %s4491_s8, %s3482_s14  ;;  %p3489_p3 = scmp.lt.u32.totalorder %s3482_s14, %s4491_s8 }
  0xf4   : > { %p3485_p0 = pnand %p3483_p13, %p3883_p8 }
  0xf6   : > { %p3486_p1 = pneg %p3485_p0 }
  0xf8   : > { %p3491_p2 = pnand %p3489_p3, %p3486_p1 }
  0xfa   : > { %3494 = shalt.err (!%p3491_p2)
}
  0xfb   : > { %s3495_s28 = scalar_lea.vmem %s4048_s24, 16  ;;  %s3502_s27 = scalar_lea.vmem %s4048_s24, 32 }
  0xfc   : > { %p3496_p5 = scmp.ne.s32.totalorder %s4048_s24, %s3495_s28  ;;  %p3503_p4 = scmp.lt.s32.totalorder %s4048_s24, %s4048_s24 }
  0xfd   : > { %p3504_p10 = scmp.lt.s32.totalorder %s3502_s27, %s3495_s28 }
  0xfe   : > { %p3498_p7 = pnand %p3496_p5, %p3883_p8 }
  0xff   : > { %p3505_p11 = por %p3504_p10, %p3503_p4 }
 0x100   : > { %p3499_p9 = pneg %p3498_p7 }
 0x102   : > { %p3506_p12 = pnand %p3505_p11, %p3499_p9 }
 0x104   : > { %3509 = shalt.err (!%p3506_p12)
}
 0x105   : > { %2939 = dma.hbm_to_vmem [thread:$0]  (!%p3867_p6), %s4491_s8, 16, %s4048_s24, [#allocation16]  }
 0x106   : > { %s3740_s17 = smov [#allocation20]   ;;  %s3510_s18 = scalar_lea.hbm %s4493_s10, 4096 }
 0x107   : > { %s484_s22 = sshll.u32 %s3740_s17, 4  ;;  %p3511_p13 = scmp.ne.s32.totalorder %s4493_s10, %s3510_s18  ;;  %s485_s22 = int_to_ptr.vmem [resolvable:$true] %s484_s22 }
 0x108   : > { %p3517_p3 = scmp.lt.u32.totalorder %s3510_s18, %s4493_s10 }
 0x109   : > { %p3513_p0 = pnand %p3511_p13, %p3883_p8 }
 0x10b   : > { %p3514_p1 = pneg %p3513_p0 }
 0x10d   : > { %p3519_p2 = pnand %p3517_p3, %p3514_p1 }
 0x10f   : > { %3522 = shalt.err (!%p3519_p2)
}
 0x110   : > { %s3523_s24 = scalar_lea.vmem %s485_s22, 4096  ;;  %p3531_p4 = scmp.lt.s32.totalorder %s485_s22, %s485_s22 }
 0x111   : > { %p3524_p5 = scmp.ne.s32.totalorder %s485_s22, %s3523_s24  ;;  %p3532_p10 = scmp.lt.s32.totalorder %s3523_s24, %s3523_s24 }
 0x113   : > { %p3526_p7 = pnand %p3524_p5, %p3883_p8  ;;  %p3533_p11 = por %p3532_p10, %p3531_p4 }
 0x115   : > { %p3527_p9 = pneg %p3526_p7 }
 0x117   : > { %p3534_p12 = pnand %p3533_p11, %p3527_p9 }
 0x119   : > { %3537 = shalt.err (!%p3534_p12)
}
 0x11a   : > { %s3741_s1 = smov 256   ;;  %s3742_s30 = smov 16  }
 0x11b   : > { %2945 = dma.hbm_to_vmem [thread:$0]  (!%p3867_p6), %s4493_s10, 4096, %s485_s22, [#allocation19], %s3741_s1, %s3741_s1, %s3742_s30  }
 0x11c   : > { %s3743_s20 = smov [#allocation23]   ;;  %s3744_s29 = smov [#allocation24]  }
 0x11d   : > { %s508_s18 = sshll.u32 %s3743_s20, 4  ;;  %s522_s19 = sshll.u32 %s3744_s29, 4  ;;  %s509_s18 = int_to_ptr.vmem [resolvable:$true] %s508_s18  ;;  %s523_s19 = int_to_ptr.vmem [resolvable:$true] %s522_s19 }
 0x11e   : > { %s3538_s24 = scalar_lea.hbm %s4495_s12, 4096 }
 0x11f   : > { %p3539_p13 = scmp.ne.s32.totalorder %s4495_s12, %s3538_s24  ;;  %p3545_p3 = scmp.lt.u32.totalorder %s3538_s24, %s4495_s12 }
 0x121   : > { %p3541_p0 = pnand %p3539_p13, %p3883_p8 }
 0x123   : > { %p3542_p1 = pneg %p3541_p0 }
 0x125   : > { %p3547_p2 = pnand %p3545_p3, %p3542_p1 }
 0x127   : > { %3550 = shalt.err (!%p3547_p2)
}
 0x128   : > { %s3551_s22 = scalar_lea.vmem %s509_s18, 4096  ;;  %p3559_p4 = scmp.lt.s32.totalorder %s509_s18, %s509_s18 }
 0x129   : > { %p3552_p5 = scmp.ne.s32.totalorder %s509_s18, %s3551_s22  ;;  %p3560_p10 = scmp.lt.s32.totalorder %s3551_s22, %s3551_s22 }
 0x12b   : > { %p3554_p7 = pnand %p3552_p5, %p3883_p8  ;;  %p3561_p11 = por %p3560_p10, %p3559_p4 }
 0x12d   : > { %p3555_p9 = pneg %p3554_p7 }
 0x12f   : > { %p3562_p12 = pnand %p3561_p11, %p3555_p9 }
 0x131   : > { %3565 = shalt.err (!%p3562_p12)
}
 0x132   : > { %s4528_s26 = smov 4   ;;  %s4529_s25 = smov 64  }
 0x133   : > { %2951 = dma.hbm_to_vmem [thread:$0]  (!%p3867_p6), %s4495_s12, 4096, %s509_s18, [#allocation22], %s4529_s25, %s4529_s25, %s4528_s26  }
 0x134   : > { %s3566_s17 = scalar_lea.hbm %s4496_s13, 16 }
 0x135   : > { %p3567_p13 = scmp.ne.s32.totalorder %s4496_s13, %s3566_s17  ;;  %p3573_p3 = scmp.lt.u32.totalorder %s3566_s17, %s4496_s13 }
 0x137   : > { %p3569_p0 = pnand %p3567_p13, %p3883_p8 }
 0x139   : > { %p3570_p1 = pneg %p3569_p0 }
 0x13b   : > { %p3575_p2 = pnand %p3573_p3, %p3570_p1 }
 0x13d   : > { %3578 = shalt.err (!%p3575_p2)
}
 0x13e   : > { %s3579_s27 = scalar_lea.vmem %s523_s19, 16  ;;  %s3586_s18 = scalar_lea.vmem %s523_s19, 32 }
 0x13f   : > { %p3580_p5 = scmp.ne.s32.totalorder %s523_s19, %s3579_s27  ;;  %p3587_p4 = scmp.lt.s32.totalorder %s523_s19, %s523_s19 }
 0x140   : > { %p3588_p10 = scmp.lt.s32.totalorder %s3586_s18, %s3579_s27 }
 0x141   : > { %p3582_p7 = pnand %p3580_p5, %p3883_p8 }
 0x142   : > { %p3589_p11 = por %p3588_p10, %p3587_p4 }
 0x143   : > { %p3583_p9 = pneg %p3582_p7 }
 0x145   : > { %p3590_p12 = pnand %p3589_p11, %p3583_p9 }
 0x147   : > { %3593 = shalt.err (!%p3590_p12)
}
 0x148   : > { %s4530_s26 = sld [smem:[#allocation38_spill]]  ;;  %s4531_s21 = sld [smem:[#allocation37_spill]] }
 0x149   : > { %s4532_s25 = sld [smem:[#allocation39_spill]]  ;;  %s2537_s0 = sadd.s32 4294967294, %s3722_s16  }
 0x14a   : > { %2954 = dma.hbm_to_vmem [thread:$0]  (!%p3867_p6), %s4496_s13, 16, %s523_s19, [#allocation25]  }
 0x14b   : > { %s4151_s23 = sadd.s32 1, %s3722_s16   ;;  %s65_s2 = sadd.s32 1, %s3718_s15 }
 0x14c   : > { %s62_s1 = ssub.s32 %s3722_s16, %s4151_s23  ;;  %p73_p0 = scmp.eq.s32.totalorder %s3722_s16, 0 }
 0x14d   : > { %p63_p13 = scmp.eq.s32.totalorder %s62_s1, 0  ;;  %p360_p9 = scmp.eq.s32.totalorder %s2537_s0, 1 }
 0x14e   : > { %p72_p8 = scmp.ne.s32.totalorder %s3718_s15, %s4530_s26  ;;  %p78_p1 = scmp.ne.s32.totalorder %s4530_s26, %s4531_s21 }
 0x14f   : > { %p354_p3 = scmp.eq.s32.totalorder %s4532_s25, 1  ;;  %p4533_p5 = scmp.eq.s32.totalorder %s4532_s25, 0 }
 0x150   : > { %s4163_s30 = scalar_select %p63_p13, %s3718_s15, %s65_s2  }
 0x151   : > { %p74_p2 = por %p73_p0, %p72_p8  ;;  %p4167_p7 = por %p4533_p5, %p78_p1 }
 0x152   : > { %p4171_p6 = por %p354_p3, %p72_p8  ;;  %p2976_p4 = scmp.lt.s32.totalorder %s3722_s16, 2 }
 0x153   : > { %s533_s14 = sand.u32 1, %s3722_s16   ;;  %p4177_p10 = por %p360_p9, %p78_p1 }
 0x154   : > { %s4535_s17 = scalar_select %p4171_p6, 1, 0 }
 0x155   : > { %s4536_s20 = scalar_select %p4177_p10, 1, 0 }
 0x156   : > { %s535_s29 = sand.u32 1, %s3718_s15   ;;  %s2691_s28 = sshll.u32 %s3722_s16, 8 }
 0x157   : > { %s2553_s27 = sshll.u32 %s535_s29, 4  ;;  %s4537_s22 = sld [smem:[#allocation42_spill]] }
 0x158   : > { %p4188_p11 = pnand %p2976_p4, %p74_p2  ;;  %s537_s25 = scalar_lea.vmem [#allocation6], %s2553_s27 }
 0x159   : > { %s544_s0 = sshll.u32 %s537_s25, 4  ;;  %s4194_s2 = scalar_lea.sflag [#allocation7], %s533_s14  ;;  %s4192_s0 = int_to_ptr.vmem [resolvable:$true] %s544_s0 }
 0x15a   : > { %p3596_p8 = pneg %p4188_p11 }
 0x15d   : > { %s4186_s26 = scalar_lea.hbm %s4537_s22, %s2691_s28  ;;  %s3599_s18 = scalar_lea.hbm %s4537_s22, 512 }
 0x15e   : > { %s3594_s1 = scalar_lea.hbm %s4186_s26, 256  ;;  %p3600_p1 = scmp.lt.u32.totalorder %s4186_s26, %s4537_s22 }
 0x15f   : > { %p3595_p12 = scmp.ne.s32.totalorder %s4186_s26, %s3594_s1  ;;  %p3601_p3 = scmp.lt.u32.totalorder %s3599_s18, %s3594_s1 }
 0x160   : > { %p3603_p5 = scmp.lt.u32.totalorder %s3594_s1, %s4186_s26 }
 0x161   : > { %p3597_p13 = pnand %p3596_p8, %p3595_p12  ;;  %p3602_p2 = por %p3601_p3, %p3600_p1 }
 0x163   : > { %p3598_p0 = pneg %p3597_p13  ;;  %p3604_p9 = por %p3603_p5, %p3602_p2 }
 0x165   : > { %p3605_p4 = pnand %p3604_p9, %p3598_p0 }
 0x167   : > { %3608 = shalt.err (!%p3605_p4)
}
 0x168   : > { %s3609_s14 = scalar_lea.vmem %s4192_s0, 256  ;;  %s3745_s27 = smov [#allocation6]  }
 0x169   : > { %p3610_p12 = scmp.ne.s32.totalorder %s4192_s0, %s3609_s14  ;;  %s3614_s25 = sshll.u32 %s3745_s27, 4  ;;  %s3615_s25 = int_to_ptr.vmem [resolvable:$false] %s3614_s25 }
 0x16a   : > { %s3616_s3 = scalar_lea.vmem %s3615_s25, 512  ;;  %p3617_p6 = scmp.lt.s32.totalorder %s4192_s0, %s3615_s25 }
 0x16b   : > { %p3612_p13 = pnand %p3610_p12, %p3596_p8  ;;  %p3618_p1 = scmp.lt.s32.totalorder %s3616_s3, %s3609_s14 }
 0x16d   : > { %p3613_p10 = pneg %p3612_p13  ;;  %p3619_p3 = por %p3618_p1, %p3617_p6 }
 0x16f   : > { %p3620_p2 = pnand %p3619_p3, %p3613_p10 }
 0x171   : > { %3623 = shalt.err (!%p3620_p2)
}
 0x172   : > { %s4539_s1 = smov 8   ;;  %s4540_s29 = smov 128  }
 0x173   : > { %2958 = dma.hbm_to_vmem [thread:$0]  (!%p4188_p11), %s4186_s26, 256, %s4192_s0, %s4194_s2, %s4540_s29, %s4540_s29, %s4539_s1  }
 0x174   : > { %s4541_s28 = sld [smem:[#allocation40_spill]] }
 0x17a   : > { %p4542_p8 = scmp.ne.s32.totalorder %s4541_s28, 0 }
 0x17b   : > { %s4543_s18 = sld [smem:[#allocation39_spill]] (!%p4542_p8) }
 0x17c   : > { %556 = sbr.rel (%p4542_p8) target bundleno = 3431 (0xd67), region = 76 }
 0x181   : > { %p4544_p0 = scmp.eq.s32.totalorder (!%p4542_p8), %s4543_s18, 0 }
 0x183   : > { %3669 = dma.done.wait (%p4544_p0), [#allocation4], 256   ;;  %p4545_p5 = pmov %p4544_p0 }
 0x184   : > { %s4546_s24 = sld [smem:[#allocation38_spill]]  ;;  %s562_s21 = sand.u32 1, %s4543_s18  }
 0x185   : > { %3671 = vsyncadd (%p4545_p5), [#allocation4], 4294967040  ;;  %s563_s26 = scalar_lea.sflag [#allocation7], %s562_s21 }
 0x18a   : > { %s564_s14 = sand.u32 1, %s4546_s24  }
 0x18b   : > { %s4235_s27 = sshll.u32 %s564_s14, 4 }
 0x18c   : > { %s4238_s0 = scalar_lea.vmem [#allocation6], %s4235_s27 }
 0x18d   : > { %3673 = dma.done.wait (%p4167_p7), %s563_s26, 256  }
 0x18e   : > { %3675 = vsyncadd (%p4167_p7), %s563_s26, 4294967040  ;;  %p4547_p6 = pmov %p4544_p0 }
 0x18f   : > { %p4548_p10 = pmov %p4544_p0 }
 0x190   : > { %3677 = dma.done.wait (%p4547_p6), [#allocation7], 3072  }
 0x191   : > { %3679 = vsyncadd (%p4548_p10), [#allocation7], 4294964224  ;;  %p4549_p11 = pmov %p4544_p0 }
 0x192   : > { %p4550_p9 = pmov %p4544_p0 }
 0x193   : > { %3681 = dma.done.wait (%p4549_p11), [#allocation10], 1072  }
 0x194   : > { %3683 = vsyncadd (%p4550_p9), [#allocation10], 4294966224  ;;  %p4551_p4 = pmov %p4544_p0 }
 0x195   : > { %p4552_p12 = pmov %p4544_p0 }
 0x196   : > { %3685 = dma.done.wait (%p4551_p4), [#allocation13], 32  }
 0x197   : > { %3687 = vsyncadd (%p4552_p12), [#allocation13], 4294967264  ;;  %p4553_p7 = pmov %p4544_p0 }
 0x198   : > { %p4554_p13 = pmov %p4544_p0 }
 0x199   : > { %3689 = dma.done.wait (%p4553_p7), [#allocation16], 32  }
 0x19a   : > { %3691 = vsyncadd (%p4554_p13), [#allocation16], 4294967264  ;;  %p4555_p1 = pmov %p4544_p0 }
 0x19b   : > { %p4556_p3 = pmov %p4544_p0 }
 0x19c   : > { %3693 = dma.done.wait (%p4555_p1), [#allocation19], 4112  }
 0x19d   : > { %3695 = vsyncadd (%p4556_p3), [#allocation19], 4294963184  ;;  %p4557_p2 = pmov %p4544_p0 }
 0x19e   : > { %p4558_p8 = pmov %p4544_p0 }
 0x19f   : > { %3697 = dma.done.wait (%p4557_p2), [#allocation22], 4160  }
 0x1a0   : > { %3699 = vsyncadd (%p4558_p8), [#allocation22], 4294963136 }
 0x1a1   : > { %3701 = dma.done.wait (%p4544_p0), [#allocation25], 16   ;;  %p4559_p5 = pmov %p4544_p0 }
 0x1a2   : > { %v662_v0 = vld [vmem:[%s4238_s0] sm:$0xff]  ;;  %v663_v1 = vld [vmem:[%s4238_s0 + $0x8] sm:$0xff]  ;;  %v3746_v4 = vmov 0.0   ;;  %v3747_v30 = vmov 0   ;;  %vm3748_vm0 = vmmov 0   ;;  %v742_v53 = vlaneseq  ;;  %s3749_s19 = smov 96  }
 0x1a3   : > { %3703 = vsyncadd (%p4559_p5), [#allocation25], 4294967280  ;;  %666 = vadd.xlane.f32.xlu0 %v662_v0  ;;  %v3052_v2 = vld [vmem:[#allocation8 + $0x4] ss:$12 sps:$4 sm:$0xff]   ;;  %v3054_v3 = vld [vmem:[#allocation8] ss:$12 sps:$4 sm:$0xff]   ;;  %2771 = vmatprep.subr.bf16.mxu1 %v3746_v4 }
 0x1a4   : > { %v3055_v5 = vld [vmem:[#allocation8 + $0x8] ss:$12 sps:$4 sm:$0xff]   ;;  %885 = vmatprep.subr.bf16.mxu0 %v3052_v2  ;;  %v3058_v15 = vld [vmem:[#allocation8 + $0x18] ss:$12 sps:$4 sm:$0xff]   ;;  %v3059_v16 = vld [vmem:[#allocation8 + $0x20] ss:$12 sps:$4 sm:$0xff]   ;;  %917 = vmatprep.mubr.bf16.mxu0 %v3747_v30 }
 0x1a5   : > { %v3056_v6 = vld [vmem:[#allocation8 + $0x1c] ss:$12 sps:$4 sm:$0xff]   ;;  %886 = vmatpush1.bf16.msra.mxu0 %v3054_v3  ;;  %2772 = vmatpush3.bf16.msra.mxu1 %v3055_v5  ;;  %v3060_v17 = vld [vmem:[#allocation8 + $0x34] ss:$12 sps:$4 sm:$0xff]   ;;  %v3063_v19 = vld [vmem:[#allocation8 + $0x38] ss:$12 sps:$4 sm:$0xff]  }
 0x1a6   : > { %887 = vmatprep.subr.bf16.mxu0 %v3056_v6  ;;  %2773 = vmatprep.subr.bf16.mxu1 %v3746_v4  ;;  %v3062_v18 = vld [vmem:[#allocation8 + $0x30] ss:$12 sps:$4 sm:$0xff]   ;;  %v3064_v20 = vld [vmem:[#allocation8 + $0x4c] ss:$12 sps:$4 sm:$0xff]   ;;  %v3066_v21 = vld [vmem:[#allocation8 + $0x48] ss:$12 sps:$4 sm:$0xff]  }
 0x1a7   : > { %668 = vadd.xlane.f32.xlu0 %v663_v1  ;;  %v3067_v22 = vld [vmem:[#allocation8 + $0x50] ss:$12 sps:$4 sm:$0xff]   ;;  %v3070_v24 = vld [vmem:[#allocation8 + $0x60] ss:$12 sps:$4 sm:$0xff]   ;;  %v3071_v25 = vld [vmem:[#allocation8 + $0x68] ss:$12 sps:$4 sm:$0xff]   ;;  %2787 = vmatprep.mubr.msk.bf16.mxu1 %vm3748_vm0, %v3746_v4 }
 0x1a8   : > { %v3068_v23 = vld [vmem:[#allocation8 + $0x64] ss:$12 sps:$4 sm:$0xff]   ;;  %v3072_v26 = vld [vmem:[#allocation8 + $0x7c] ss:$12 sps:$4 sm:$0xff]   ;;  %v3075_v28 = vld [vmem:[#allocation8 + $0x80] ss:$12 sps:$4 sm:$0xff]  }
 0x1a9   : > { %888 = vmatpush1.bf16.msra.mxu0 %v3058_v15  ;;  %2774 = vmatpush3.bf16.msra.mxu1 %v3059_v16  ;;  %v3074_v27 = vld [vmem:[#allocation8 + $0x78] ss:$12 sps:$4 sm:$0xff]   ;;  %v3076_v29 = vld [vmem:[#allocation8 + $0x94] ss:$12 sps:$4 sm:$0xff]   ;;  %v3078_v31 = vld [vmem:[#allocation8 + $0x90] ss:$12 sps:$4 sm:$0xff]  }
 0x1aa   : > { %2775 = vmatprep.subr.bf16.mxu1 %v3746_v4  ;;  %889 = vmatprep.subr.bf16.mxu0 %v3060_v17  ;;  %v3079_v32 = vld [vmem:[#allocation8 + $0x98] ss:$12 sps:$4 sm:$0xff]   ;;  %v3082_v34 = vld [vmem:[#allocation8 + $0xa8] ss:$12 sps:$4 sm:$0xff]   ;;  %v3083_v35 = vld [vmem:[#allocation8 + $0xb0] ss:$12 sps:$4 sm:$0xff]  }
 0x1ab   : > { %v3080_v33 = vld [vmem:[#allocation8 + $0xac] ss:$12 sps:$4 sm:$0xff]   ;;  %v2572_v44 = vld [vmem:[#allocation14] ss:$0 sm:$0xff]  ;;  %v2573_v48 = vld [vmem:[#allocation15] ss:$0 sm:$0xff] }
 0x1ac   : > { %v4301_v54 = vshrl.u32 %v742_v53, 7  ;;  %v740_v57 = vld [vmem:[#allocation9] sm:$0x7]  ;;  %vm972_vm1 = vcmask 261120   ;;  %v4321_v17 = vld [vmem:[#allocation3] sm:$0xff]  ;;  %vm1020_vm2 = vcmask 130048  }
 0x1ad   : > { %890 = vmatpush1.bf16.msra.mxu0 %v3062_v18  ;;  %2776 = vmatpush3.bf16.msra.mxu1 %v3063_v19  ;;  %v4323_v19 = vld [vmem:[#allocation3 + $0x8] sm:$0xff]  ;;  %s3750_s2 = smov 64   ;;  %s3751_s25 = smov 32   ;;  %vm1219_vm3 = vcmask 523520   ;;  %vm1347_vm4 = vcmask 785920   ;;  %vm1475_vm5 = vcmask 1048320  }
 0x1ae   : > { %2777 = vmatprep.subr.bf16.mxu1 %v3746_v4  ;;  %891 = vmatprep.subr.bf16.mxu0 %v3064_v20  ;;  %v744_v55 = vsub.s32 0, %v4301_v54  ;;  %v752_v56 = vsub.s32 2, %v4301_v54  ;;  %v748_v58 = vsub.s32 1, %v4301_v54  ;;  %s658_s3 = scalar_lea.vmem [#allocation26], %s4235_s27  ;;  %s2692_s29 = sshll.u32 %s4543_s18, 8 }
 0x1af   : > { %s2338_s1 = sshll.u32 %s658_s3, 4  ;;  %s4560_s26 = sld [smem:[#allocation45_spill]]  ;;  %s4431_s1 = int_to_ptr.vmem [resolvable:$true] %s2338_s1 }
 0x1b0   : > { %v745_v59 = vrot.slane %v740_v57, %v744_v55  ;;  %v753_v60 = vrot.slane %v740_v57, %v752_v56  ;;  %v749_v63 = vrot.slane %v740_v57, %v748_v58  ;;  %s4441_s27 = scalar_lea.sflag [#allocation5], %s564_s14  ;;  %s3624_s18 = scalar_lea.vmem %s4431_s1, 256 }
 0x1b1   : > { %892 = vmatpush1.bf16.msra.mxu0 %v3066_v21  ;;  %2778 = vmatpush3.bf16.msra.mxu1 %v3067_v22  ;;  %p3625_p6 = scmp.ne.s32.totalorder %s4431_s1, %s3624_s18  ;;  %p4561_p10 = scmp.ne.s32.totalorder %s4535_s17, 0 }
 0x1b2   : > { %2779 = vmatprep.subr.bf16.mxu1 %v3746_v4  ;;  %893 = vmatprep.subr.bf16.mxu0 %v3068_v23 }
 0x1b3   : > { %p3626_p11 = pnand %p3625_p6, %p4561_p10 }
 0x1b5   : > { %894 = vmatpush1.bf16.msra.mxu0 %v3070_v24  ;;  %2780 = vmatpush3.bf16.msra.mxu1 %v3071_v25  ;;  %p3627_p9 = pneg %p3626_p11 }
 0x1b6   : > { %895 = vmatprep.subr.bf16.mxu0 %v3072_v26  ;;  %2781 = vmatprep.subr.bf16.mxu1 %v3746_v4 }
 0x1b9   : > { %896 = vmatpush1.bf16.msra.mxu0 %v3074_v27  ;;  %2782 = vmatpush3.bf16.msra.mxu1 %v3075_v28 }
 0x1ba   : > { %897 = vmatprep.subr.bf16.mxu0 %v3076_v29  ;;  %2783 = vmatprep.subr.bf16.mxu1 %v3746_v4 }
 0x1bd   : > { %898 = vmatpush1.bf16.msra.mxu0 %v3078_v31  ;;  %2784 = vmatpush3.bf16.msra.mxu1 %v3079_v32 }
 0x1be   : > { %899 = vmatprep.subr.bf16.mxu0 %v3080_v33  ;;  %2785 = vmatprep.subr.bf16.mxu1 %v3746_v4 }
 0x1c1   : > { %900 = vmatpush1.bf16.msra.mxu0 %v3082_v34  ;;  %2786 = vmatpush3.bf16.msra.mxu1 %v3083_v35 }
 0x1c2   : > { %2791 = vmatprep.subr.bf16.mxu1 %v3746_v4  ;;  %2815 = vmatprep.subr.bf16.mxu0 %v3746_v4 }
 0x230   : > { %v667_v7 = vpop.xlane.xlu0 %666 }
 0x231   : > { %v671_v8 = vmul.f32 0.0078125, %v667_v7 }
 0x233   : > { %v4276_v9 = vsub.f32 %v662_v0, %v671_v8 }
 0x234   : > { %v669_v10 = vpop.xlane.xlu0 %668 }
 0x235   : > { %v672_v11 = vmul.f32 0.0078125, %v669_v10  ;;  %v675_v12 = vmul.f32 %v4276_v9, %v4276_v9 }
 0x237   : > { %v4280_v13 = vsub.f32 %v663_v1, %v672_v11  ;;  %677 = vadd.xlane.f32.xlu1 %v675_v12 }
 0x239   : > { %v676_v14 = vmul.f32 %v4280_v13, %v4280_v13 }
 0x23b   : > { %679 = vadd.xlane.f32.xlu1 %v676_v14 }
 0x2c4   : > { %v678_v36 = vpop.xlane.xlu1 %677 }
 0x2c5   : > { %v681_v37 = vmul.f32 0.0078125, %v678_v36 }
 0x2c7   : > { %v683_v38 = vadd.f32 1e-05, %v681_v37 }
 0x2c8   : > { %v680_v39 = vpop.xlane.xlu1 %679 }
 0x2c9   : > { %3172 = vrsqrt.f32 %v683_v38  ;;  %v682_v40 = vmul.f32 0.0078125, %v680_v39 }
 0x2cb   : > { %v684_v41 = vadd.f32 1e-05, %v682_v40 }
 0x2cd   : > { %3174 = vrsqrt.f32 %v684_v41 }
 0x2d3   : > { %v3173_v42 = vpop.eup %3172 }
 0x2d4   : > { %v687_v43 = vmul.f32 %v3173_v42, %v4276_v9 }
 0x2d6   : > { %v696_v47 = vmul.f32 %v2572_v44, %v687_v43 }
 0x2d7   : > { %v3175_v45 = vpop.eup %3174 }
 0x2d8   : > { %v688_v46 = vmul.f32 %v3175_v45, %v4280_v13  ;;  %v705_v50 = vadd.f32 %v2573_v48, %v696_v47 }
 0x2da   : > { %v697_v49 = vmul.f32 %v2572_v44, %v688_v46 }
 0x2dc   : > { %v706_v51 = vadd.f32 %v2573_v48, %v697_v49 }
 0x2de   : > { %v707_v52 = vpack.c.bf16 %v706_v51, %v705_v50 }
 0x2e0   : > { %918 = vmatmul.mubr.bf16.vlgmr.msra.gmra.mrb[0].mxu0 %v707_v52  ;;  %2788 = vmatmul.mubr.bf16.vlgmr.msra.gmra.mrb[0].mxu1 %v707_v52 }
 0x2e1   : > { %2793 = vmatprep.mubr.msk.bf16.mxu1 %vm3748_vm0, %v3746_v4  ;;  %2817 = vmatprep.mubr.msk.bf16.mxu0 %vm3748_vm0, %v3746_v4 }
 0x3b3   : > { %v919_v61 = vpop.f32.mrb[0].mxu0  ;;  %v962_v62 = vpop.f32.mrb[0].mxu1 }
 0x3b4   : > { %v921_v0 = vpop.f32.mrb[1].mxu0  ;;  %v2789_v1 = vpop.f32.mrb[1].mxu1  ;;  %v920_v5 = vadd.f32 %v919_v61, %v745_v59  ;;  %v963_v6 = vadd.f32 %v962_v62, %v753_v60 }
 0x3b5   : > { %v923_v2 = vpop.f32.mrb[2].mxu0  ;;  %v965_v3 = vpop.f32.mrb[2].mxu1  ;;  %v922_v11 = vadd.f32 %v921_v0, %v749_v63 }
 0x3b6   : > { %v924_v7 = vadd.f32 %v923_v2, %v745_v59  ;;  %v966_v8 = vadd.f32 %v965_v3, %v753_v60  ;;  %v925_v9 = vpop.f32.mrb[3].mxu0  ;;  %v2790_v10 = vpop.f32.mrb[3].mxu1 }
 0x3b7   : > { %v926_v12 = vadd.f32 %v925_v9, %v749_v63 }
 0x3b8   : > { %v969_v13 = vpack.c.bf16 %v924_v7, %v920_v5  ;;  %v4312_v14 = vpack.c.bf16 %v966_v8, %v963_v6 }
 0x3b9   : > { %v970_v15 = vpack.c.bf16 %v926_v12, %v922_v11 }
 0x3bb   : > { %v977_v16 = vsel %vm972_vm1, %v970_v15, 0 }
 0x3bc   : > { %2792 = vmatpush3.bf16.xpose.msra.mxu1 %v977_v16 }
 0x3bd   : > { %2797 = vmatprep.subr.bf16.mxu1 %v3746_v4 }
 0x3c3   : > { %2794 = vmatmul.mubr.msk.bf16.vlgmr.msra.gmra.mrb[4].mxu1 %vm972_vm1, %v969_v13 }
 0x3c4   : > { %2798 = vmatpush3.bf16.msra.mxu1 %v4312_v14  ;;  %2799 = vmatprep.mubr.msk.bf16.mxu1 %vm3748_vm0, %v3746_v4 }
 0x3c5   : > { %2803 = vmatprep.subr.bf16.mxu1 %v3746_v4 }
 0x496   : > { %v1013_v18 = vpop.f32.mrb[4].mxu1 }
 0x497   : > { %v1014_v20 = vadd.f32 %v1013_v18, %v4321_v17  ;;  %v2795_v21 = vpop.f32.mrb[5].mxu1 }
 0x498   : > { %v1016_v22 = vpop.f32.mrb[6].mxu1 }
 0x499   : > { %v1017_v23 = vadd.f32 %v1016_v22, %v4323_v19  ;;  %v2796_v24 = vpop.f32.mrb[7].mxu1  ;;  %v1021_v25 = vsel %vm1020_vm2, %v1014_v20, -inf }
 0x49a   : > { %1022 = vmax.xlane.f32.xlu0 %v1021_v25 }
 0x49b   : > { %v1024_v26 = vsel %vm1020_vm2, %v1017_v23, -inf }
 0x49c   : > { %1025 = vmax.xlane.f32.xlu1 %v1024_v26 }
 0x527   : > { %v1023_v27 = vpop.xlane.xlu0 %1022 }
 0x528   : > { %v1027_v28 = vsub.f32 %v1014_v20, %v1023_v27 }
 0x529   : > { %v1026_v29 = vpop.xlane.xlu1 %1025 }
 0x52a   : > { %v1029_v31 = vmul.f32 1.442695, %v1027_v28  ;;  %v1028_v32 = vsub.f32 %v1017_v23, %v1026_v29 }
 0x52c   : > { %3176 = vpow2.f32 %v1029_v31  ;;  %v1031_v33 = vmul.f32 1.442695, %v1028_v32 }
 0x52e   : > { %3178 = vpow2.f32 %v1031_v33 }
 0x536   : > { %v3177_v34 = vpop.eup %3176 }
 0x537   : > { %v1033_v35 = vsel %vm1020_vm2, %v3177_v34, 0.0 }
 0x538   : > { %v3179_v36 = vpop.eup %3178  ;;  %1034 = vadd.xlane.f32.xlu0 %v1033_v35 }
 0x539   : > { %v1036_v37 = vsel %vm1020_vm2, %v3179_v36, 0.0 }
 0x53a   : > { %1037 = vadd.xlane.f32.xlu1 %v1036_v37 }
 0x54b   : > { %1091 = vrot.lane.b32.xlu1 %v969_v13, %s3749_s19 }
 0x54e   : > { %1094 = vrot.lane.b32.xlu0 %v970_v15, %s3749_s19 }
 0x54f   : > { %1223 = vrot.lane.b32.xlu1 %v970_v15, %s3750_s2 }
 0x552   : > { %1351 = vrot.lane.b32.xlu0 %v970_v15, %s3751_s25 }
 0x553   : > { %1221 = vrot.lane.b32.xlu1 %v969_v13, %s3750_s2 }
 0x557   : > { %1349 = vrot.lane.b32.xlu1 %v969_v13, %s3751_s25 }
 0x5c5   : > { %v1035_v38 = vpop.xlane.xlu0 %1034 }
 0x5c6   : > { %3180 = vrcp.f32 %v1035_v38 }
 0x5c7   : > { %v1038_v39 = vpop.xlane.xlu1 %1037 }
 0x5c8   : > { %3182 = vrcp.f32 %v1038_v39 }
 0x5c9   : > { %v1095_v41 = vpop.permute.xlu0 %1094 }
 0x5ca   : > { %v1100_v50 = vsel %vm972_vm1, %v1095_v41, 0 }
 0x5cb   : > { %v1092_v40 = vpop.permute.xlu1 %1091 }
 0x5cd   : > { %v1352_v48 = vpop.permute.xlu0 %1351 }
 0x5ce   : > { %v1357_v52 = vsel %vm972_vm1, %v1352_v48, 0 }
 0x5cf   : > { %v1224_v42 = vpop.permute.xlu1 %1223 }
 0x5d0   : > { %v3181_v43 = vpop.eup %3180  ;;  %v1229_v44 = vsel %vm972_vm1, %v1224_v42, 0 }
 0x5d1   : > { %2816 = vmatpush3.bf16.xpose.msra.mxu0 %v1229_v44  ;;  %v1041_v46 = vmul.f32 %v3181_v43, %v3177_v34 }
 0x5d2   : > { %v3183_v45 = vpop.eup %3182  ;;  %2827 = vmatprep.subr.bf16.mxu0 %v3746_v4 }
 0x5d3   : > { %v1042_v47 = vmul.f32 %v3183_v45, %v3179_v36  ;;  %v1222_v51 = vpop.permute.xlu1 %1221 }
 0x5d5   : > { %v1043_v49 = vpack.c.bf16 %v1042_v47, %v1041_v46 }
 0x5d7   : > { %2800 = vmatmul.mubr.msk.bf16.vlgmr.msra.gmra.mrb[8].mxu1 %vm1020_vm2, %v1043_v49  ;;  %v1350_v53 = vpop.permute.xlu1 %1349 }
 0x5d8   : > { %2804 = vmatpush3.bf16.xpose.msra.mxu1 %v1100_v50  ;;  %2818 = vmatmul.mubr.msk.bf16.vlgmr.msra.gmra.mrb[4].mxu0 %vm972_vm1, %v1222_v51 }
 0x5d9   : > { %2828 = vmatpush3.bf16.xpose.msra.mxu0 %v1357_v52  ;;  %2805 = vmatprep.mubr.msk.bf16.mxu1 %vm3748_vm0, %v3746_v4 }
 0x5da   : > { %2829 = vmatprep.mubr.msk.bf16.mxu0 %vm3748_vm0, %v3746_v4  ;;  %2809 = vmatprep.subr.bf16.mxu1 %v3746_v4 }
 0x5db   : > { %2839 = vmatprep.subr.bf16.mxu0 %v3746_v4 }
 0x5df   : > { %2806 = vmatmul.mubr.msk.bf16.vlgmr.msra.gmra.mrb[12].mxu1 %vm972_vm1, %v1092_v40 }
 0x5e0   : > { %2830 = vmatmul.mubr.msk.bf16.vlgmr.msra.gmra.mrb[8].mxu0 %vm972_vm1, %v1350_v53  ;;  %2811 = vmatprep.mubr.msk.bf16.mxu1 %vm3748_vm0, %v3746_v4 }
 0x5e1   : > { %2855 = vmatprep.mubr.msk.bf16.mxu0 %vm3748_vm0, %v3746_v4 }
 0x6aa   : > { %v1081_v57 = vpop.f32.mrb[8].mxu1 }
 0x6ab   : > { %v2801_v59 = vpop.f32.mrb[9].mxu1  ;;  %v1265_v60 = vpop.f32.mrb[4].mxu0 }
 0x6ac   : > { %v1084_v61 = vpop.f32.mrb[10].mxu1  ;;  %v2819_v62 = vpop.f32.mrb[5].mxu0  ;;  %v1266_v10 = vadd.f32 %v1265_v60, %v4321_v17 }
 0x6ad   : > { %v1088_v63 = vpack.c.bf16 %v1084_v61, %v1081_v57  ;;  %v2802_v0 = vpop.f32.mrb[11].mxu1  ;;  %v1268_v1 = vpop.f32.mrb[6].mxu0 }
 0x6ae   : > { %v2820_v2 = vpop.f32.mrb[7].mxu0  ;;  %v1269_v21 = vadd.f32 %v1268_v1, %v4323_v19  ;;  %v1272_v22 = vsel %vm1020_vm2, %v1266_v10, -inf }
 0x6af   : > { %1089 = vst.msk [vmem:[#allocation2] sm:$0xff] %vm972_vm1, %v1088_v63 }
 0x6b0   : > { %v1275_v25 = vsel %vm1020_vm2, %v1269_v21, -inf }
 0x6b2   : > { %v1136_v3 = vpop.f32.mrb[12].mxu1 }
 0x6b3   : > { %v1137_v5 = vadd.f32 %v1136_v3, %v4321_v17  ;;  %v2807_v6 = vpop.f32.mrb[13].mxu1  ;;  %v1393_v7 = vpop.f32.mrb[8].mxu0 }
 0x6b4   : > { %v1139_v8 = vpop.f32.mrb[14].mxu1  ;;  %v2831_v9 = vpop.f32.mrb[9].mxu0  ;;  %v1394_v24 = vadd.f32 %v1393_v7, %v4321_v17 }
 0x6b5   : > { %v1140_v11 = vadd.f32 %v1139_v8, %v4323_v19  ;;  %v2808_v12 = vpop.f32.mrb[15].mxu1  ;;  %v1396_v13 = vpop.f32.mrb[10].mxu0  ;;  %v1143_v15 = vsel %vm1020_vm2, %v1137_v5, -inf }
 0x6b6   : > { %v2832_v16 = vpop.f32.mrb[11].mxu0  ;;  %1144 = vmax.xlane.f32.xlu0 %v1143_v15  ;;  %v1397_v18 = vadd.f32 %v1396_v13, %v4323_v19  ;;  %v1400_v26 = vsel %vm1020_vm2, %v1394_v24, -inf }
 0x6b7   : > { %v1146_v20 = vsel %vm1020_vm2, %v1140_v11, -inf }
 0x6b8   : > { %1147 = vmax.xlane.f32.xlu1 %v1146_v20  ;;  %v1403_v23 = vsel %vm1020_vm2, %v1397_v18, -inf }
 0x6ba   : > { %1273 = vmax.xlane.f32.xlu0 %v1272_v22 }
 0x6bc   : > { %1404 = vmax.xlane.f32.xlu1 %v1403_v23  ;;  %v3084_v23 = vld [vmem:[#allocation11] sm:$0xff]  }
 0x6bd   : > { %2840 = vmatpush3.bf16.msra.mxu0 %v3084_v23  ;;  %v3110_v23 = vld [vmem:[#allocation20 + $0x60] ss:$16 sps:$4 sm:$0xff]  }
 0x6be   : > { %1276 = vmax.xlane.f32.xlu0 %v1275_v25  ;;  %2841 = vmatprep.subr.bf16.mxu0 %v3746_v4  ;;  %v3086_v25 = vld [vmem:[#allocation11 + $0x10] sm:$0xff]  }
 0x6c2   : > { %1401 = vmax.xlane.f32.xlu0 %v1400_v26  ;;  %v3087_v26 = vld [vmem:[#allocation11 + $0x18] sm:$0xff]  }
 0x743   : > { %v1145_v27 = vpop.xlane.xlu0 %1144 }
 0x744   : > { %v1149_v36 = vsub.f32 %v1137_v5, %v1145_v27 }
 0x745   : > { %v1148_v28 = vpop.xlane.xlu1 %1147 }
 0x746   : > { %v1150_v37 = vsub.f32 %v1140_v11, %v1148_v28  ;;  %v1151_v41 = vmul.f32 1.442695, %v1149_v36  ;;  %v3088_v28 = vld [vmem:[#allocation11 + $0x20] sm:$0xff]  }
 0x747   : > { %v1274_v29 = vpop.xlane.xlu0 %1273 }
 0x748   : > { %v1278_v31 = vsub.f32 %v1266_v10, %v1274_v29  ;;  %v1153_v42 = vmul.f32 1.442695, %v1150_v37 }
 0x749   : > { %v1405_v32 = vpop.xlane.xlu1 %1404 }
 0x74a   : > { %v1280_v19 = vmul.f32 1.442695, %v1278_v31  ;;  %v1407_v33 = vsub.f32 %v1397_v18, %v1405_v32  ;;  %v3089_v32 = vld [vmem:[#allocation11 + $0x28] sm:$0xff]  }
 0x74b   : > { %v1277_v34 = vpop.xlane.xlu0 %1276 }
 0x74c   : > { %3184 = vpow2.f32 %v1280_v19  ;;  %v1279_v35 = vsub.f32 %v1269_v21, %v1277_v34  ;;  %v1410_v38 = vmul.f32 1.442695, %v1407_v33 }
 0x74e   : > { %v1282_v17 = vmul.f32 1.442695, %v1279_v35  ;;  %v3090_v35 = vld [vmem:[#allocation11 + $0x30] sm:$0xff]  }
 0x74f   : > { %v1402_v39 = vpop.xlane.xlu0 %1401 }
 0x750   : > { %3186 = vpow2.f32 %v1282_v17  ;;  %v1406_v40 = vsub.f32 %v1394_v24, %v1402_v39  ;;  %v3085_v24 = vld [vmem:[#allocation11 + $0x8] sm:$0xff]  }
 0x751   : > { %3188 = vpow2.f32 %v1410_v38  ;;  %2842 = vmatpush3.bf16.msra.mxu0 %v3085_v24  ;;  %v3091_v38 = vld [vmem:[#allocation11 + $0x38] sm:$0xff]   ;;  %v3113_v24 = vld [vmem:[#allocation20 + $0x68] ss:$16 sps:$4 sm:$0xff]  }
 0x752   : > { %v1408_v43 = vmul.f32 1.442695, %v1406_v40  ;;  %2843 = vmatprep.subr.bf16.mxu0 %v3746_v4 }
 0x754   : > { %3190 = vpow2.f32 %v1408_v43 }
 0x755   : > { %3192 = vpow2.f32 %v1151_v41  ;;  %2844 = vmatpush3.bf16.msra.mxu0 %v3086_v25  ;;  %v3118_v25 = vld [vmem:[#allocation20 + $0x84] ss:$16 sps:$4 sm:$0xff]  }
 0x756   : > { %v3185_v44 = vpop.eup %3184  ;;  %3194 = vpow2.f32 %v1153_v42  ;;  %2845 = vmatprep.subr.bf16.mxu0 %v3746_v4 }
 0x757   : > { %v1284_v45 = vsel %vm1020_vm2, %v3185_v44, 0.0 }
 0x758   : > { %1285 = vadd.xlane.f32.xlu0 %v1284_v45 }
 0x759   : > { %2846 = vmatpush3.bf16.msra.mxu0 %v3087_v26  ;;  %v3121_v26 = vld [vmem:[#allocation20 + $0x8c] ss:$16 sps:$4 sm:$0xff]  }
 0x75a   : > { %v3187_v46 = vpop.eup %3186  ;;  %2847 = vmatprep.subr.bf16.mxu0 %v3746_v4 }
 0x75b   : > { %v1287_v47 = vsel %vm1020_vm2, %v3187_v46, 0.0  ;;  %v3189_v48 = vpop.eup %3188 }
 0x75c   : > { %1288 = vadd.xlane.f32.xlu1 %v1287_v47  ;;  %v1415_v52 = vsel %vm1020_vm2, %v3189_v48, 0.0 }
 0x75d   : > { %2848 = vmatpush3.bf16.msra.mxu0 %v3088_v28  ;;  %v3119_v28 = vld [vmem:[#allocation20 + $0x88] ss:$16 sps:$4 sm:$0xff]  }
 0x75e   : > { %v3191_v49 = vpop.eup %3190  ;;  %2849 = vmatprep.subr.bf16.mxu0 %v3746_v4 }
 0x75f   : > { %v3193_v50 = vpop.eup %3192  ;;  %v1412_v51 = vsel %vm1020_vm2, %v3191_v49, 0.0 }
 0x760   : > { %v3195_v53 = vpop.eup %3194  ;;  %1413 = vadd.xlane.f32.xlu0 %v1412_v51  ;;  %1416 = vadd.xlane.f32.xlu1 %v1415_v52  ;;  %v1155_v57 = vsel %vm1020_vm2, %v3193_v50, 0.0 }
 0x761   : > { %v1158_v59 = vsel %vm1020_vm2, %v3195_v53, 0.0  ;;  %2850 = vmatpush3.bf16.msra.mxu0 %v3089_v32  ;;  %v3122_v32 = vld [vmem:[#allocation20 + $0xa0] ss:$16 sps:$4 sm:$0xff]  }
 0x762   : > { %2851 = vmatprep.subr.bf16.mxu0 %v3746_v4 }
 0x764   : > { %1156 = vadd.xlane.f32.xlu0 %v1155_v57  ;;  %1159 = vadd.xlane.f32.xlu1 %v1158_v59  ;;  %v3229_v59 = vld [vmem:[%s4238_s0 + $0x8] sm:$0xff] }
 0x765   : > { %2852 = vmatpush3.bf16.msra.mxu0 %v3090_v35  ;;  %v3128_v35 = vld [vmem:[#allocation20 + $0xc0] ss:$16 sps:$4 sm:$0xff]  }
 0x766   : > { %2853 = vmatprep.subr.bf16.mxu0 %v3746_v4 }
 0x769   : > { %2854 = vmatpush3.bf16.msra.mxu0 %v3091_v38  ;;  %v3139_v38 = vld [vmem:[#allocation20 + $0xec] ss:$16 sps:$4 sm:$0xff]  }
 0x775   : > { %1295 = vrot.lane.b32.xlu1 %v4312_v14, %s3750_s2 }
 0x779   : > { %1423 = vrot.lane.b32.xlu1 %v4312_v14, %s3751_s25 }
 0x77a   : > { %1167 = vrot.lane.b32.xlu0 %v4312_v14, %s3749_s19 }
 0x7e5   : > { %v1286_v60 = vpop.xlane.xlu0 %1285 }
 0x7e9   : > { %v1289_v61 = vpop.xlane.xlu1 %1288 }
 0x7ed   : > { %v1414_v62 = vpop.xlane.xlu0 %1413  ;;  %v1417_v63 = vpop.xlane.xlu1 %1416 }
 0x7f1   : > { %v1157_v0 = vpop.xlane.xlu0 %1156  ;;  %v1160_v1 = vpop.xlane.xlu1 %1159 }
 0x7f2   : > { %3196 = vrcp.f32 %v1157_v0  ;;  %v3094_v0 = vld [vmem:[#allocation20 + $0x4] ss:$16 sps:$4 sm:$0xff]  }
 0x7f3   : > { %3198 = vrcp.f32 %v1160_v1  ;;  %v3097_v1 = vld [vmem:[#allocation20 + $0xc] ss:$16 sps:$4 sm:$0xff]  }
 0x7f4   : > { %3200 = vrcp.f32 %v1289_v61  ;;  %1892 = vmatprep.subr.bf16.mxu0 %v3097_v1  ;;  %v3144_v1 = vld [vmem:[#allocation23 + $0x48] sm:$0xff]  }
 0x7f5   : > { %v1168_v2 = vpop.permute.xlu0 %1167  ;;  %3202 = vrcp.f32 %v1286_v60  ;;  %v1296_v9 = vpop.permute.xlu1 %1295 }
 0x7f6   : > { %2810 = vmatpush3.bf16.msra.mxu1 %v1168_v2  ;;  %3204 = vrcp.f32 %v1414_v62  ;;  %v3100_v2 = vld [vmem:[#allocation20 + $0x24] ss:$16 sps:$4 sm:$0xff]  }
 0x7f7   : > { %2821 = vmatprep.subr.bf16.mxu1 %v3746_v4  ;;  %3206 = vrcp.f32 %v1417_v63  ;;  %v3092_v63 = vld [vmem:[#allocation20] ss:$16 sps:$4 sm:$0xff]  }
 0x7f9   : > { %v1424_v18 = vpop.permute.xlu1 %1423 }
 0x7fc   : > { %v3197_v3 = vpop.eup %3196 }
 0x7fd   : > { %v3199_v5 = vpop.eup %3198  ;;  %v1163_v6 = vmul.f32 %v3197_v3, %v3193_v50  ;;  %v3228_v50 = vld [vmem:[%s4238_s0] sm:$0xff]  ;;  %v3103_v3 = vld [vmem:[#allocation20 + $0x2c] ss:$16 sps:$4 sm:$0xff]   ;;  %s4436_s0 = scalar_lea.hbm %s4560_s26, %s2692_s29 }
 0x7fe   : > { %v1164_v7 = vmul.f32 %v3199_v5, %v3195_v53  ;;  %v3201_v8 = vpop.eup %3200  ;;  %v3098_v5 = vld [vmem:[#allocation20 + $0x20] ss:$16 sps:$4 sm:$0xff]  }
 0x7ff   : > { %v3203_v10 = vpop.eup %3202  ;;  %v1293_v11 = vmul.f32 %v3201_v8, %v3187_v46 }
 0x800   : > { %v1165_v14 = vpack.c.bf16 %v1164_v7, %v1163_v6  ;;  %v1292_v12 = vmul.f32 %v3203_v10, %v3185_v44  ;;  %v3205_v13 = vpop.eup %3204  ;;  %v3101_v6 = vld [vmem:[#allocation20 + $0x28] ss:$16 sps:$4 sm:$0xff]  }
 0x801   : > { %v3207_v16 = vpop.eup %3206  ;;  %v1420_v20 = vmul.f32 %v3205_v13, %v3191_v49  ;;  %v2614_v49 = vld [vmem:[#allocation12] ss:$0 sm:$0xff] }
 0x802   : > { %2812 = vmatmul.mubr.msk.bf16.vlgmr.msra.gmra.mrb[16].mxu1 %vm1020_vm2, %v1165_v14  ;;  %v1294_v15 = vpack.c.bf16 %v1293_v11, %v1292_v12  ;;  %v1421_v21 = vmul.f32 %v3207_v16, %v3189_v48  ;;  %v3109_v16 = vld [vmem:[#allocation20 + $0x4c] ss:$16 sps:$4 sm:$0xff]  }
 0x803   : > { %2822 = vmatpush3.bf16.msra.mxu1 %v1296_v9  ;;  %2823 = vmatprep.mubr.msk.bf16.mxu1 %vm3748_vm0, %v3746_v4 }
 0x804   : > { %2833 = vmatprep.subr.bf16.mxu1 %v3746_v4  ;;  %v1422_v22 = vpack.c.bf16 %v1421_v21, %v1420_v20  ;;  %v3107_v20 = vld [vmem:[#allocation20 + $0x48] ss:$16 sps:$4 sm:$0xff]   ;;  %v3112_v21 = vld [vmem:[#allocation20 + $0x64] ss:$16 sps:$4 sm:$0xff]  }
 0x80a   : > { %2824 = vmatmul.mubr.msk.bf16.vlgmr.msra.gmra.mrb[20].mxu1 %vm1020_vm2, %v1294_v15  ;;  %v3106_v15 = vld [vmem:[#allocation20 + $0x44] ss:$16 sps:$4 sm:$0xff]  }
 0x80b   : > { %2834 = vmatpush3.bf16.msra.mxu1 %v1424_v18  ;;  %2835 = vmatprep.mubr.msk.bf16.mxu1 %vm3748_vm0, %v3746_v4  ;;  %v3104_v18 = vld [vmem:[#allocation20 + $0x40] ss:$16 sps:$4 sm:$0xff]  }
 0x80c   : > { %1849 = vmatprep.subr.bf16.mxu1 %v3094_v0  ;;  %v3142_v0 = vld [vmem:[#allocation23] sm:$0xff]  }
 0x812   : > { %2836 = vmatmul.mubr.msk.bf16.vlgmr.msra.gmra.mrb[24].mxu1 %vm1020_vm2, %v1422_v22  ;;  %v3115_v22 = vld [vmem:[#allocation20 + $0x6c] ss:$16 sps:$4 sm:$0xff]  }
 0x813   : > { %1881 = vmatprep.mubr.bf16.mxu1 %v3747_v30  ;;  %1850 = vmatpush1.bf16.msra.mxu1 %v3092_v63  ;;  %v3141_v63 = vld [vmem:[#allocation23 + $0xc0] sm:$0xff]  }
 0x814   : > { %1851 = vmatprep.subr.bf16.mxu1 %v3100_v2  ;;  %v3145_v2 = vld [vmem:[#allocation23 + $0xc8] sm:$0xff]  }
 0x817   : > { %1852 = vmatpush1.bf16.msra.mxu1 %v3098_v5  ;;  %v3147_v5 = vld [vmem:[#allocation23 + $0x88] sm:$0xff]  }
 0x818   : > { %1853 = vmatprep.subr.bf16.mxu1 %v3106_v15  ;;  %v3157_v15 = vld [vmem:[#allocation23 + $0xe0] sm:$0xff]  }
 0x81b   : > { %1854 = vmatpush1.bf16.msra.mxu1 %v3104_v18  ;;  %v3159_v18 = vld [vmem:[#allocation23 + $0xa0] sm:$0xff]  }
 0x81c   : > { %1855 = vmatprep.subr.bf16.mxu1 %v3112_v21  ;;  %v3161_v21 = vld [vmem:[#allocation23 + $0xe8] sm:$0xff]  }
 0x81f   : > { %1856 = vmatpush1.bf16.msra.mxu1 %v3110_v23  ;;  %v3163_v23 = vld [vmem:[#allocation23 + $0xa8] sm:$0xff]  }
 0x820   : > { %1857 = vmatprep.subr.bf16.mxu1 %v3118_v25  ;;  %v3165_v25 = vld [vmem:[#allocation23 + $0xf0] sm:$0xff]  }
 0x8d5   : > { %v1207_v27 = vpop.f32.mrb[16].mxu1 }
 0x8d6   : > { %v2813_v29 = vpop.f32.mrb[17].mxu1 }
 0x8d7   : > { %v1210_v31 = vpop.f32.mrb[18].mxu1  ;;  %v3124_v29 = vld [vmem:[#allocation20 + $0xa4] ss:$16 sps:$4 sm:$0xff]  }
 0x8d8   : > { %v1214_v19 = vpack.c.bf16 %v1210_v31, %v1207_v27  ;;  %v2814_v33 = vpop.f32.mrb[19].mxu1  ;;  %v3116_v27 = vld [vmem:[#allocation20 + $0x80] ss:$16 sps:$4 sm:$0xff]   ;;  %v3127_v31 = vld [vmem:[#allocation20 + $0xac] ss:$16 sps:$4 sm:$0xff]  }
 0x8d9   : > { %1858 = vmatpush1.bf16.msra.mxu1 %v3116_v27  ;;  %v3130_v33 = vld [vmem:[#allocation20 + $0xc4] ss:$16 sps:$4 sm:$0xff]  }
 0x8da   : > { %1216 = vrot.lane.b32.xlu1 %v1214_v19, %s3751_s25  ;;  %v3125_v19 = vld [vmem:[#allocation20 + $0xa8] ss:$16 sps:$4 sm:$0xff]   ;;  %1859 = vmatprep.subr.bf16.mxu1 %v3124_v29  ;;  %v3169_v29 = vld [vmem:[#allocation23 + $0xf8] sm:$0xff]  }
 0x8db   : > { %v3167_v27 = vld [vmem:[#allocation23 + $0xb0] sm:$0xff]  }
 0x8dd   : > { %v1335_v34 = vpop.f32.mrb[20].mxu1  ;;  %1860 = vmatpush1.bf16.msra.mxu1 %v3122_v32  ;;  %v3171_v32 = vld [vmem:[#allocation23 + $0xb8] sm:$0xff]  }
 0x8de   : > { %v2825_v36 = vpop.f32.mrb[21].mxu1  ;;  %1861 = vmatprep.subr.bf16.mxu1 %v3130_v33  ;;  %v1683_v33 = vsub.s32 3, %v4301_v54 }
 0x8df   : > { %v1338_v37 = vpop.f32.mrb[22].mxu1  ;;  %v3131_v36 = vld [vmem:[#allocation20 + $0xc8] ss:$16 sps:$4 sm:$0xff]  }
 0x8e0   : > { %v1342_v17 = vpack.c.bf16 %v1338_v37, %v1335_v34  ;;  %v2826_v39 = vpop.f32.mrb[23].mxu1  ;;  %v3133_v34 = vld [vmem:[#allocation20 + $0xcc] ss:$16 sps:$4 sm:$0xff]   ;;  %v3136_v37 = vld [vmem:[#allocation20 + $0xe4] ss:$16 sps:$4 sm:$0xff]  }
 0x8e1   : > { %1862 = vmatpush1.bf16.msra.mxu1 %v3128_v35  ;;  %v3137_v39 = vld [vmem:[#allocation20 + $0xe8] ss:$16 sps:$4 sm:$0xff]  }
 0x8e2   : > { %1344 = vrot.lane.b32.xlu0 %v1342_v17, %s3750_s2  ;;  %v3134_v17 = vld [vmem:[#allocation20 + $0xe0] ss:$16 sps:$4 sm:$0xff]   ;;  %1863 = vmatprep.subr.bf16.mxu1 %v3136_v37 }
 0x8e5   : > { %v1463_v40 = vpop.f32.mrb[24].mxu1  ;;  %1864 = vmatpush1.bf16.msra.mxu1 %v3134_v17 }
 0x8e6   : > { %v2837_v41 = vpop.f32.mrb[25].mxu1 }
 0x8e7   : > { %v1466_v42 = vpop.f32.mrb[26].mxu1 }
 0x8e8   : > { %v1470_v43 = vpack.c.bf16 %v1466_v42, %v1463_v40  ;;  %v2838_v44 = vpop.f32.mrb[27].mxu1 }
 0x8ea   : > { %1472 = vrot.lane.b32.xlu1 %v1470_v43, %s3749_s19  ;;  %s3752_s19 = smov [#allocation26]  }
 0x8eb   : > { %s3628_s2 = sshll.u32 %s3752_s19, 4  ;;  %s3629_s2 = int_to_ptr.vmem [resolvable:$false] %s3628_s2 }
 0x8ec   : > { %s3630_s25 = scalar_lea.vmem %s3629_s2, 512  ;;  %p3631_p4 = scmp.lt.s32.totalorder %s4431_s1, %s3629_s2 }
 0x8ed   : > { %p3632_p12 = scmp.lt.s32.totalorder %s3630_s25, %s3624_s18 }
 0x8ef   : > { %p3633_p7 = por %p3632_p12, %p3631_p4 }
 0x8f1   : > { %p3634_p13 = pnand %p3633_p7, %p3627_p9 }
 0x94c   : > { %v1217_v45 = vpop.permute.xlu1 %1216 }
 0x94d   : > { %1220 = vst.msk [vmem:[#allocation2] sm:$0xff] %vm1219_vm3, %v1217_v45 }
 0x954   : > { %v1345_v46 = vpop.permute.xlu0 %1344 }
 0x955   : > { %1348 = vst.msk [vmem:[#allocation2] sm:$0xff] %vm1347_vm4, %v1345_v46 }
 0x95c   : > { %v1473_v4 = vpop.permute.xlu1 %1472 }
 0x95d   : > { %1476 = vst.msk [vmem:[#allocation2] sm:$0xff] %vm1475_vm5, %v1473_v4 }
 0x964   : > { %v1477_v47 = vld [vmem:[#allocation2] sm:$0xff] }
 0x965   : > { %2856 = vmatmul.mubr.bf16.vlgmr.msra.gmra.mrb[12].mxu0 %v1477_v47  ;;  %v2615_v47 = vld [vmem:[#allocation17] ss:$0 sm:$0xff] }
 0x966   : > { %1924 = vmatprep.mubr.bf16.mxu0 %v3747_v30  ;;  %v3095_v30 = vld [vmem:[#allocation20 + $0x8] ss:$16 sps:$4 sm:$0xff]  }
 0x967   : > { %1893 = vmatpush1.bf16.msra.mxu0 %v3095_v30  ;;  %v3143_v30 = vld [vmem:[#allocation23 + $0x80] sm:$0xff]  }
 0x968   : > { %1894 = vmatprep.subr.bf16.mxu0 %v3103_v3  ;;  %v3146_v3 = vld [vmem:[#allocation23 + $0x8] sm:$0xff]  }
 0x96b   : > { %1895 = vmatpush1.bf16.msra.mxu0 %v3101_v6  ;;  %v3148_v6 = vld [vmem:[#allocation23 + $0x50] sm:$0xff]  }
 0x96c   : > { %1896 = vmatprep.subr.bf16.mxu0 %v3109_v16  ;;  %v3158_v16 = vld [vmem:[#allocation23 + $0x20] sm:$0xff]  }
 0x96f   : > { %1897 = vmatpush1.bf16.msra.mxu0 %v3107_v20  ;;  %v3160_v20 = vld [vmem:[#allocation23 + $0x68] sm:$0xff]  }
 0x970   : > { %1898 = vmatprep.subr.bf16.mxu0 %v3115_v22  ;;  %v3162_v22 = vld [vmem:[#allocation23 + $0x28] sm:$0xff]  }
 0x973   : > { %1899 = vmatpush1.bf16.msra.mxu0 %v3113_v24  ;;  %v3164_v24 = vld [vmem:[#allocation23 + $0x70] sm:$0xff]  }
 0x974   : > { %1900 = vmatprep.subr.bf16.mxu0 %v3121_v26  ;;  %v3166_v26 = vld [vmem:[#allocation23 + $0x30] sm:$0xff]  }
 0x977   : > { %1901 = vmatpush1.bf16.msra.mxu0 %v3119_v28  ;;  %v3168_v28 = vld [vmem:[#allocation23 + $0x78] sm:$0xff]  }
 0x978   : > { %1902 = vmatprep.subr.bf16.mxu0 %v3127_v31  ;;  %v3170_v31 = vld [vmem:[#allocation23 + $0x38] sm:$0xff]  }
 0x97b   : > { %1903 = vmatpush1.bf16.msra.mxu0 %v3125_v19  ;;  %v1667_v19 = vld [vmem:[#allocation21] sm:$0xf] }
 0x97c   : > { %1904 = vmatprep.subr.bf16.mxu0 %v3133_v34  ;;  %v1672_v34 = vrot.slane %v1667_v19, %v744_v55  ;;  %v1680_v35 = vrot.slane %v1667_v19, %v752_v56  ;;  %v1684_v17 = vrot.slane %v1667_v19, %v1683_v33 }
 0x97f   : > { %1905 = vmatpush1.bf16.msra.mxu0 %v3131_v36 }
 0x980   : > { %1906 = vmatprep.subr.bf16.mxu0 %v3139_v38  ;;  %v1676_v38 = vrot.slane %v1667_v19, %v748_v58 }
 0x983   : > { %1907 = vmatpush1.bf16.msra.mxu0 %v3137_v39 }
 0x984   : > { %2749 = vmatprep.subr.bf16.mxu0 %v3141_v63 }
 0xa38   : > { %v1576_v48 = vpop.f32.mrb[12].mxu0 }
 0xa39   : > { %v1583_v51 = vadd.f32 %v3228_v50, %v1576_v48  ;;  %v2857_v52 = vpop.f32.mrb[13].mxu0 }
 0xa3a   : > { %v1579_v53 = vpop.f32.mrb[14].mxu0 }
 0xa3b   : > { %v4402_v57 = vadd.f32 %v2614_v49, %v1583_v51  ;;  %v1584_v60 = vadd.f32 %v3229_v59, %v1579_v53  ;;  %v2858_v61 = vpop.f32.mrb[15].mxu0  ;;  %v2616_v51 = vld [vmem:[#allocation18] ss:$0 sm:$0xff] }
 0xa3c   : > { %v3140_v61 = vld [vmem:[#allocation23 + $0x40] sm:$0xff]  }
 0xa3d   : > { %v4405_v62 = vadd.f32 %v2614_v49, %v1584_v60  ;;  %1594 = vadd.xlane.f32.xlu0 %v4402_v57  ;;  %2727 = vmatprep.subr.bf16.mxu1 %v3140_v61 }
 0xa3f   : > { %1596 = vadd.xlane.f32.xlu1 %v4405_v62 }
 0xaca   : > { %v1595_v7 = vpop.xlane.xlu0 %1594 }
 0xacb   : > { %v1598_v14 = vmul.f32 0.0078125, %v1595_v7  ;;  %v3149_v7 = vld [vmem:[#allocation23 + $0xd0] sm:$0xff]  }
 0xacc   : > { %v1597_v8 = vpop.xlane.xlu1 %1596 }
 0xacd   : > { %v4410_v9 = vsub.f32 %v4402_v57, %v1598_v14  ;;  %v1599_v10 = vmul.f32 0.0078125, %v1597_v8  ;;  %v3150_v14 = vld [vmem:[#allocation23 + $0x10] sm:$0xff]  }
 0xace   : > { %v3151_v8 = vld [vmem:[#allocation23 + $0x90] sm:$0xff]  }
 0xacf   : > { %v4413_v11 = vsub.f32 %v4405_v62, %v1599_v10  ;;  %v1602_v12 = vmul.f32 %v4410_v9, %v4410_v9  ;;  %v3153_v10 = vld [vmem:[#allocation23 + $0xd8] sm:$0xff]  }
 0xad1   : > { %1604 = vadd.xlane.f32.xlu0 %v1602_v12  ;;  %v1603_v13 = vmul.f32 %v4413_v11, %v4413_v11  ;;  %v3155_v12 = vld [vmem:[#allocation23 + $0x98] sm:$0xff]  }
 0xad5   : > { %1606 = vadd.xlane.f32.xlu0 %v1603_v13  ;;  %v3156_v13 = vld [vmem:[#allocation23 + $0x60] sm:$0xff]  }
 0xb5e   : > { %v1605_v40 = vpop.xlane.xlu0 %1604 }
 0xb5f   : > { %v1608_v41 = vmul.f32 0.0078125, %v1605_v40 }
 0xb61   : > { %v1610_v42 = vadd.f32 1e-05, %v1608_v41 }
 0xb62   : > { %v1607_v43 = vpop.xlane.xlu0 %1606 }
 0xb63   : > { %3208 = vrsqrt.f32 %v1610_v42  ;;  %v1609_v44 = vmul.f32 0.0078125, %v1607_v43 }
 0xb65   : > { %v1611_v45 = vadd.f32 1e-05, %v1609_v44 }
 0xb67   : > { %3210 = vrsqrt.f32 %v1611_v45 }
 0xb6d   : > { %v3209_v46 = vpop.eup %3208 }
 0xb6e   : > { %v1614_v4 = vmul.f32 %v3209_v46, %v4410_v9  ;;  %v3152_v9 = vld [vmem:[#allocation23 + $0x58] sm:$0xff]  }
 0xb70   : > { %v1623_v50 = vmul.f32 %v2615_v47, %v1614_v4 }
 0xb71   : > { %v3211_v48 = vpop.eup %3210 }
 0xb72   : > { %v1615_v49 = vmul.f32 %v3211_v48, %v4413_v11  ;;  %v1632_v53 = vadd.f32 %v2616_v51, %v1623_v50  ;;  %v3154_v11 = vld [vmem:[#allocation23 + $0x18] sm:$0xff]  }
 0xb74   : > { %v1624_v52 = vmul.f32 %v2615_v47, %v1615_v49 }
 0xb76   : > { %v1633_v59 = vadd.f32 %v2616_v51, %v1624_v52 }
 0xb78   : > { %v1634_v60 = vpack.c.bf16 %v1633_v59, %v1632_v53 }
 0xb7a   : > { %1882 = vmatmul.mubr.bf16.vlgmr.msra.gmra.mrb[28].mxu1 %v1634_v60  ;;  %1925 = vmatmul.mubr.bf16.vlgmr.msra.gmra.mrb[16].mxu0 %v1634_v60 }
 0xb7b   : > { %2728 = vmatpush3.bf16.msra.mxu1 %v3142_v0  ;;  %2750 = vmatpush3.bf16.msra.mxu0 %v3143_v30 }
 0xb7c   : > { %2729 = vmatprep.subr.bf16.mxu1 %v3144_v1  ;;  %2751 = vmatprep.subr.bf16.mxu0 %v3145_v2 }
 0xb7f   : > { %2730 = vmatpush3.bf16.msra.mxu1 %v3146_v3  ;;  %2752 = vmatpush3.bf16.msra.mxu0 %v3147_v5 }
 0xb80   : > { %2731 = vmatprep.subr.bf16.mxu1 %v3148_v6  ;;  %2753 = vmatprep.subr.bf16.mxu0 %v3149_v7 }
 0xb83   : > { %2732 = vmatpush3.bf16.msra.mxu1 %v3150_v14  ;;  %2754 = vmatpush3.bf16.msra.mxu0 %v3151_v8 }
 0xb84   : > { %2733 = vmatprep.subr.bf16.mxu1 %v3152_v9  ;;  %2755 = vmatprep.subr.bf16.mxu0 %v3153_v10 }
 0xb87   : > { %2734 = vmatpush3.bf16.msra.mxu1 %v3154_v11  ;;  %2756 = vmatpush3.bf16.msra.mxu0 %v3155_v12 }
 0xb88   : > { %2735 = vmatprep.subr.bf16.mxu1 %v3156_v13  ;;  %2757 = vmatprep.subr.bf16.mxu0 %v3157_v15 }
 0xb8b   : > { %2736 = vmatpush3.bf16.msra.mxu1 %v3158_v16  ;;  %2758 = vmatpush3.bf16.msra.mxu0 %v3159_v18 }
 0xb8c   : > { %2737 = vmatprep.subr.bf16.mxu1 %v3160_v20  ;;  %2759 = vmatprep.subr.bf16.mxu0 %v3161_v21 }
 0xb8f   : > { %2738 = vmatpush3.bf16.msra.mxu1 %v3162_v22  ;;  %2760 = vmatpush3.bf16.msra.mxu0 %v3163_v23 }
 0xb90   : > { %2739 = vmatprep.subr.bf16.mxu1 %v3164_v24  ;;  %2761 = vmatprep.subr.bf16.mxu0 %v3165_v25 }
 0xb93   : > { %2740 = vmatpush3.bf16.msra.mxu1 %v3166_v26  ;;  %2762 = vmatpush3.bf16.msra.mxu0 %v3167_v27  ;;  %v2653_v26 = vld [vmem:[#allocation24] ss:$0 sm:$0xff] }
 0xb94   : > { %2741 = vmatprep.subr.bf16.mxu1 %v3168_v28  ;;  %2763 = vmatprep.subr.bf16.mxu0 %v3169_v29 }
 0xb97   : > { %2742 = vmatpush3.bf16.msra.mxu1 %v3170_v31  ;;  %2764 = vmatpush3.bf16.msra.mxu0 %v3171_v32 }
 0xc4d   : > { %v1883_v36 = vpop.f32.mrb[28].mxu1  ;;  %v1926_v37 = vpop.f32.mrb[16].mxu0 }
 0xc4e   : > { %v1885_v39 = vpop.f32.mrb[29].mxu1  ;;  %v1928_v40 = vpop.f32.mrb[17].mxu0  ;;  %v1884_v43 = vadd.f32 %v1883_v36, %v1672_v34  ;;  %v1927_v44 = vadd.f32 %v1926_v37, %v1680_v35 }
 0xc4f   : > { %v1887_v41 = vpop.f32.mrb[30].mxu1  ;;  %v1930_v42 = vpop.f32.mrb[18].mxu0  ;;  %v1886_v55 = vadd.f32 %v1885_v39, %v1676_v38  ;;  %v1929_v48 = vadd.f32 %v1928_v40, %v1684_v17 }
 0xc50   : > { %v1888_v45 = vadd.f32 %v1887_v41, %v1672_v34  ;;  %v1931_v46 = vadd.f32 %v1930_v42, %v1680_v35  ;;  %v1889_v4 = vpop.f32.mrb[31].mxu1  ;;  %v1932_v47 = vpop.f32.mrb[19].mxu0 }
 0xc51   : > { %v1890_v49 = vadd.f32 %v1889_v4, %v1676_v38  ;;  %v1933_v56 = vadd.f32 %v1932_v47, %v1684_v17 }
 0xc52   : > { %v1935_v50 = vpack.c.bf16 %v1888_v45, %v1884_v43  ;;  %v1937_v51 = vpack.c.bf16 %v1931_v46, %v1927_v44 }
 0xc53   : > { %v1936_v52 = vpack.c.bf16 %v1890_v49, %v1886_v55  ;;  %v1938_v54 = vpack.c.bf16 %v1933_v56, %v1929_v48 }
 0xc54   : > { %v2649_v58 = vmul.bf16 3218784218, %v1935_v50  ;;  %v2651_v53 = vmul.bf16 3218784218, %v1937_v51 }
 0xc55   : > { %v2650_v59 = vmul.bf16 3218784218, %v1936_v52  ;;  %v2652_v60 = vmul.bf16 3218784218, %v1938_v54 }
 0xc56   : > { %v1948_v61 = vmul.bf16 1069105081, %v2649_v58  ;;  %v1954_v63 = vmul.bf16 1069105081, %v2651_v53 }
 0xc57   : > { %v1951_v0 = vmul.bf16 1069105081, %v2650_v59  ;;  %v1957_v30 = vmul.bf16 1069105081, %v2652_v60 }
 0xc58   : > { %3212 = vpow.bf16 %v1948_v61 }
 0xc59   : > { %3214 = vpow.bf16 %v1954_v63 }
 0xc5a   : > { %3216 = vpow.bf16 %v1951_v0 }
 0xc5b   : > { %3218 = vpow.bf16 %v1957_v30 }
 0xc63   : > { %v3213_v1 = vpop.eup %3212 }
 0xc64   : > { %v3215_v2 = vpop.eup %3214  ;;  %v1959_v3 = vadd.bf16 1065369472, %v3213_v1 }
 0xc65   : > { %v3217_v5 = vpop.eup %3216  ;;  %v1961_v6 = vadd.bf16 1065369472, %v3215_v2 }
 0xc66   : > { %v3219_v7 = vpop.eup %3218  ;;  %3220 = vrcp.bf16 %v1959_v3  ;;  %v1960_v14 = vadd.bf16 1065369472, %v3217_v5 }
 0xc67   : > { %3222 = vrcp.bf16 %v1961_v6  ;;  %v1962_v8 = vadd.bf16 1065369472, %v3219_v7 }
 0xc68   : > { %3224 = vrcp.bf16 %v1960_v14 }
 0xc69   : > { %3226 = vrcp.bf16 %v1962_v8 }
 0xc71   : > { %v3221_v9 = vpop.eup %3220 }
 0xc72   : > { %v3223_v10 = vpop.eup %3222  ;;  %v1964_v12 = vmul.bf16 1065369472, %v3221_v9 }
 0xc73   : > { %v3225_v11 = vpop.eup %3224  ;;  %v1968_v15 = vmul.bf16 1065369472, %v3223_v10 }
 0xc74   : > { %v3227_v13 = vpop.eup %3226  ;;  %v1966_v16 = vmul.bf16 1065369472, %v3225_v11  ;;  %v1971_v21 = vmul.bf16 %v1964_v12, %v1935_v50 }
 0xc75   : > { %v1970_v18 = vmul.bf16 1065369472, %v3227_v13  ;;  %v1973_v23 = vmul.bf16 %v1968_v15, %v1937_v51 }
 0xc76   : > { %v1972_v20 = vmul.bf16 %v1966_v16, %v1936_v52 }
 0xc77   : > { %v1974_v22 = vmul.bf16 %v1970_v18, %v1938_v54 }
 0xc78   : > { %2270 = vmatprep.mubr.bf16.mxu1 %v1972_v20 }
 0xc79   : > { %2311 = vmatprep.mubr.bf16.mxu0 %v1974_v22  ;;  %2271 = vmatmul.mubr.bf16.vlgmr.msra.gmra.mrb[32].mxu1 %v1971_v21 }
 0xc7a   : > { %2312 = vmatmul.mubr.bf16.vlgmr.msra.gmra.mrb[20].mxu0 %v1973_v23 }
 0xd4c   : > { %v2743_v24 = vpop.f32.mrb[32].mxu1 }
 0xd4d   : > { %v2765_v25 = vpop.f32.mrb[20].mxu0  ;;  %v2744_v27 = vpop.f32.mrb[33].mxu1 }
 0xd4e   : > { %v2745_v28 = vadd.f32 %v2744_v27, %v2743_v24  ;;  %v2766_v29 = vpop.f32.mrb[21].mxu0  ;;  %v2746_v31 = vpop.f32.mrb[34].mxu1 }
 0xd4f   : > { %v2767_v32 = vadd.f32 %v2766_v29, %v2765_v25  ;;  %v2768_v19 = vpop.f32.mrb[22].mxu0  ;;  %v2747_v33 = vpop.f32.mrb[35].mxu1 }
 0xd50   : > { %v2273_v34 = vadd.f32 %v2745_v28, %v2653_v26  ;;  %v2748_v35 = vadd.f32 %v2747_v33, %v2746_v31  ;;  %v2769_v36 = vpop.f32.mrb[23].mxu0 }
 0xd51   : > { %v2770_v37 = vadd.f32 %v2769_v36, %v2768_v19 }
 0xd52   : > { %v2314_v38 = vadd.f32 %v2767_v32, %v2273_v34  ;;  %v2276_v17 = vadd.f32 %v2748_v35, %v2653_v26 }
 0xd54   : > { %v2320_v39 = vadd.f32 %v2314_v38, %v4402_v57  ;;  %v2317_v40 = vadd.f32 %v2770_v37, %v2276_v17 }
 0xd56   : > { %2322 = vst [vmem:[%s658_s3] sm:$0xff] %v2320_v39  ;;  %v2321_v41 = vadd.f32 %v2317_v40, %v4405_v62 }
 0xd58   : > { %2323 = vst [vmem:[%s658_s3 + $0x8] sm:$0xff] %v2321_v41 }
 0xd59   : > { %3637 = shalt.err (!%p3634_p13)
}
 0xd5a   : > { %s3638_s24 = scalar_lea.hbm %s4436_s0, 256  ;;  %s3642_s29 = scalar_lea.hbm %s4560_s26, 512 }
 0xd5b   : > { %p3639_p1 = scmp.ne.s32.totalorder %s4436_s0, %s3638_s24  ;;  %p3643_p8 = scmp.lt.u32.totalorder %s4436_s0, %s4560_s26 }
 0xd5c   : > { %p3644_p0 = scmp.lt.u32.totalorder %s3642_s29, %s3638_s24  ;;  %p3646_p6 = scmp.lt.u32.totalorder %s3638_s24, %s4436_s0 }
 0xd5d   : > { %p3640_p3 = pnand %p3639_p1, %p4561_p10 }
 0xd5e   : > { %p3645_p5 = por %p3644_p0, %p3643_p8 }
 0xd5f   : > { %p3641_p2 = pneg %p3640_p3 }
 0xd60   : > { %p3647_p11 = por %p3646_p6, %p3645_p5 }
 0xd62   : > { %p3648_p9 = pnand %p3647_p11, %p3641_p2 }
 0xd64   : > { %3651 = shalt.err (!%p3648_p9)
}
 0xd65   : > { %s3753_s18 = smov 128   ;;  %s3754_s19 = smov 8  }
 0xd66   : > { %2913 = dma.vmem_to_hbm [thread:$0]  (%p4561_p10), %s4431_s1, 256, %s4436_s0, %s4441_s27, %s3753_s18, %s3753_s18, %s3754_s19  }
 0xd67 PF: > { %s4562_s2 = sld [smem:[#allocation37_spill]]  ;;  %p4563_p4 = scmp.ne.s32.totalorder %s4536_s20, 0 }
 0xd68   : > { %p4564_p12 = scmp.ge.s32.totalorder %s3722_s16, 2 }
 0xd6a   : > { %p2960_p7 = pnand %p4564_p12, %p4563_p4 }
 0xd6d   : > { %s2353_s25 = sand.u32 1, %s4562_s2  }
 0xd6e   : > { %s2354_s24 = scalar_lea.sflag [#allocation5], %s2353_s25 }
 0xd6f   : > { %3705 = dma.done.wait (!%p2960_p7), %s2354_s24, 256  }
 0xd70   : > { %3707 = vsyncadd (!%p2960_p7), %s2354_s24, 4294967040  ;;  %s4565_s29 = sld [smem:[#allocation38_spill]]  ;;  %s4566_s14 = smov %s4163_s30 }
 0xd71   : > { %p34_p13 = scmp.ge.s32.totalorder %s4151_s23, 4   ;;  %s4567_s30 = smov %s3718_s15 }
 0xd72   : > { %s4568_s15 = smov %s4566_s14  ;;  %s4569_s16 = smov %s4151_s23 }
 0xd73   :  { %36 = sbr.rel (!%p34_p13) target bundleno = 18 (0x12), region = 174 }
 0xd7a   :  { %2359 = vsyncpa [#allocation4], 1 }
 0xd7b   :  { %2361 = vsyncpa [#allocation4 + $0x1], 1 }
 0xd7c   :  { %2362 = vsyncpa [#allocation7], 1 }
 0xd7d   :  { %2364 = vsyncpa [#allocation7 + $0x1], 1 }
 0xd7e   :  { %2365 = vsyncpa [#allocation10], 1 }
 0xd7f   :  { %2366 = vsyncpa [#allocation13], 1 }
 0xd80   :  { %2367 = vsyncpa [#allocation16], 1 }
 0xd81   :  { %2368 = vsyncpa [#allocation19], 1 }
 0xd82   :  { %2369 = vsyncpa [#allocation22], 1 }
 0xd83   :  { %2370 = vsyncpa [#allocation25], 1 }
 0xd84   :  { %2371 = vsyncpa [#allocation5], 1 }
 0xd85   :  { %2373 = vsyncpa [#allocation5 + $0x1], 1 }

</bundles_post_ra>
